<compile_context>
chip_gen: v5e
topology: v5e:2x2
jax: 0.10.0
libtpu: 0.0.40
codegen_flags: <defaults>
</compile_context>

<pallas_src>
import functools

import numpy as np
import jax
import jax.numpy as jnp
from jax.experimental import pallas as pl
from jax.experimental.pallas import tpu as pltpu

BN_EPS = 1e-3
_VMEM = pl.BlockSpec(memory_space=pltpu.MemorySpace.VMEM)

# torchvision efficientnet_v2_s inverted-residual setting:
# (expand_ratio, kernel, stride, in_ch, out_ch, num_layers, block_type)
V2_S_CONFIG = [
    (1, 3, 1, 24, 24, 2, "fused"),
    (4, 3, 2, 24, 48, 4, "fused"),
    (4, 3, 2, 48, 64, 4, "fused"),
    (4, 3, 2, 64, 128, 6, "mbconv"),
    (6, 3, 1, 128, 160, 9, "mbconv"),
    (6, 3, 2, 160, 256, 15, "mbconv"),
]
HEAD_IN, HEAD_OUT = 256, 1280  # lastconv (classifier[1].in_features == 1280)


# ----------------------------------------------------------------------------
# Small helpers
# ----------------------------------------------------------------------------
def _act(y, act):
    if act == "silu":
        return y * jax.nn.sigmoid(y)
    if act == "relu":
        return jnp.maximum(y, 0.0)
    if act == "sigmoid":
        return jax.nn.sigmoid(y)
    return y


def _pad_to(x, axis, target):
    pad = target - x.shape[axis]
    if pad <= 0:
        return x
    widths = [(0, 0)] * x.ndim
    widths[axis] = (0, pad)
    return jnp.pad(x, widths)


def _pick_tile(dim, full_max, candidates, pad_tile):
    """Return (tile, padded_dim) obeying the TPU (8,128) block rule."""
    if dim <= full_max:
        return dim, dim                    # full-dim block: no divisibility constraint
    for t in candidates:
        if dim % t == 0:
            return t, dim
    padded = dim + ((-dim) % pad_tile)
    return pad_tile, padded


# ----------------------------------------------------------------------------
# Fused conv-as-matmul kernel:  out = act(a [*scale] @ W + bias) [+ residual]
# a: [B, M, K] bf16, W: [K, N] bf16, bias f32; grid (B, Mb, Nb, Kb), f32 accumulator.
# ----------------------------------------------------------------------------
def _conv_mm_kernel(act, has_scale, has_res, nk, *refs):
    idx = 0
    a_ref = refs[idx]; idx += 1
    w_ref = refs[idx]; idx += 1
    b_ref = refs[idx]; idx += 1
    s_ref = None
    r_ref = None
    if has_scale:
        s_ref = refs[idx]; idx += 1
    if has_res:
        r_ref = refs[idx]; idx += 1
    o_ref = refs[idx]
    acc_ref = refs[idx + 1]

    k = pl.program_id(3)

    @pl.when(k == 0)
    def _():
        acc_ref[...] = jnp.zeros_like(acc_ref)

    a = a_ref[0]                                   # (TM, TK) bf16
    if has_scale:
        a = a * s_ref[0]                           # SE gate prologue (bf16)
    acc_ref[...] += jnp.dot(a, w_ref[...], preferred_element_type=jnp.float32)

    @pl.when(k == nk - 1)
    def _():
        y = acc_ref[...] + b_ref[0]                # f32 bias add
        y = _act(y, act)
        if has_res:
            y = y + r_ref[0].astype(jnp.float32)   # fused residual add
        o_ref[0] = y.astype(o_ref.dtype)


@functools.partial(jax.jit, static_argnames=("act",))
def conv_matmul(a, w, b, scale=None, residual=None, *, act="none"):
    """a: [B, M, K] bf16, w: [K, N] bf16, b: [N] f32,
    scale: optional [B, 1, K] (per-batch channel gate), residual: optional [B, M, N]."""
    B, M, K = a.shape
    N = w.shape[1]
    TM, Mp = _pick_tile(M, 512, (512, 256, 128, 64), 256)
    TK, Kp = _pick_tile(K, 1024, (512, 256, 128), 512)
    TN, Np = _pick_tile(N, 1024, (512, 256, 128), 512)

    a_p = _pad_to(_pad_to(a, 1, Mp), 2, Kp)
    w_p = _pad_to(_pad_to(w, 0, Kp), 1, Np)
    b_p = _pad_to(b.reshape(1, 1, N).astype(jnp.float32), 2, Np)

    operands = [a_p, w_p, b_p]
    in_specs = [
        pl.BlockSpec((1, TM, TK), lambda bb, i, j, k: (bb, i, k)),
        pl.BlockSpec((TK, TN), lambda bb, i, j, k: (k, j)),
        pl.BlockSpec((1, 1, TN), lambda bb, i, j, k: (0, 0, j)),
    ]
    has_scale = scale is not None
    has_res = residual is not None
    if has_scale:
        operands.append(_pad_to(scale.astype(jnp.bfloat16), 2, Kp))
        in_specs.append(pl.BlockSpec((1, 1, TK), lambda bb, i, j, k: (bb, 0, k)))
    if has_res:
        operands.append(_pad_to(_pad_to(residual.astype(jnp.bfloat16), 1, Mp), 2, Np))
        in_specs.append(pl.BlockSpec((1, TM, TN), lambda bb, i, j, k: (bb, i, j)))

    nk = Kp // TK
    out = pl.pallas_call(
        functools.partial(_conv_mm_kernel, act, has_scale, has_res, nk),
        grid=(B, Mp // TM, Np // TN, nk),
        in_specs=in_specs,
        out_specs=pl.BlockSpec((1, TM, TN), lambda bb, i, j, k: (bb, i, j)),
        out_shape=jax.ShapeDtypeStruct((B, Mp, Np), jnp.bfloat16),
        scratch_shapes=[pltpu.VMEM((TM, TN), jnp.float32)],
        compiler_params=pltpu.CompilerParams(
            dimension_semantics=("parallel", "parallel", "parallel", "arbitrary")),
    )(*operands)
    if Mp != M or Np != N:
        out = out[:, :M, :N]
    return out


# ----------------------------------------------------------------------------
# Depthwise kxk conv (+ folded BN + SiLU):  x [taps, B, M, C] bf16 -> [B, M, C] bf16
# ----------------------------------------------------------------------------
def _dw_kernel(taps, x_ref, w_ref, b_ref, o_ref):
    y = jnp.zeros(o_ref.shape[1:], jnp.float32)          # (TM, TC)
    for t in range(taps):                                 # short, fully unrolled
        y = y + x_ref[t, 0].astype(jnp.float32) * w_ref[pl.ds(t, 1), :]
    y = y + b_ref[...]
    o_ref[0] = (y * jax.nn.sigmoid(y)).astype(o_ref.dtype)   # SiLU


@jax.jit
def depthwise_bias_act(x, w, b):
    taps, B, M, C = x.shape
    TM, Mp = _pick_tile(M, 256, (256, 128, 64), 128)
    TC, Cp = _pick_tile(C, 1024, (512, 256, 128), 512)
    xp = _pad_to(_pad_to(x, 2, Mp), 3, Cp)
    wp = _pad_to(w, 1, Cp)
    bp = _pad_to(b.reshape(1, C), 1, Cp)
    out = pl.pallas_call(
        functools.partial(_dw_kernel, taps),
        grid=(B, Mp // TM, Cp // TC),
        in_specs=[
            pl.BlockSpec((taps, 1, TM, TC), lambda bb, i, j: (0, bb, i, j)),
            pl.BlockSpec((taps, TC), lambda bb, i, j: (0, j)),
            pl.BlockSpec((1, TC), lambda bb, i, j: (0, j)),
        ],
        out_specs=pl.BlockSpec((1, TM, TC), lambda bb, i, j: (bb, i, j)),
        out_shape=jax.ShapeDtypeStruct((B, Mp, Cp), jnp.bfloat16),
        compiler_params=pltpu.CompilerParams(
            dimension_semantics=("parallel", "parallel", "parallel")),
    )(xp, wp, bp)
    return out[:, :M, :C]


# ----------------------------------------------------------------------------
# Fused squeeze-excite gate: spatial-mean reduction + FC(SiLU) + FC(Sigmoid)
# x [B, HW, C] bf16 -> gate s [B, C] bf16
# ----------------------------------------------------------------------------
def _se_kernel(nhw, inv_hw, x_ref, w1_ref, b1_ref, w2_ref, b2_ref, o_ref, acc_ref):
    i = pl.program_id(1)

    @pl.when(i == 0)
    def _():
        acc_ref[...] = jnp.zeros_like(acc_ref)

    acc_ref[...] += jnp.sum(x_ref[0].astype(jnp.float32), axis=0, keepdims=True)

    @pl.when(i == nhw - 1)
    def _():
        pooled = acc_ref[...] * inv_hw                                    # (1, C)
        h = jnp.dot(pooled, w1_ref[...], preferred_element_type=jnp.float32) + b1_ref[...]
        h = h * jax.nn.sigmoid(h)                                         # SiLU
        s = jnp.dot(h, w2_ref[...], preferred_element_type=jnp.float32) + b2_ref[...]
        o_ref[...] = jax.nn.sigmoid(s).astype(o_ref.dtype)


@jax.jit
def squeeze_excite_gate(x, w1, b1, w2, b2):
    B, HW, C = x.shape
    Csq = w1.shape[1]
    THW, HWp = _pick_tile(HW, 1024, (512, 256, 128), 512)
    xp = _pad_to(x, 1, HWp)
    nhw = HWp // THW
    return pl.pallas_call(
        functools.partial(_se_kernel, nhw, 1.0 / HW),
        grid=(B, nhw),
        in_specs=[
            pl.BlockSpec((1, THW, C), lambda bb, i: (bb, i, 0)),
            pl.BlockSpec((C, Csq), lambda bb, i: (0, 0)),
            pl.BlockSpec((1, Csq), lambda bb, i: (0, 0)),
            pl.BlockSpec((Csq, C), lambda bb, i: (0, 0)),
            pl.BlockSpec((1, C), lambda bb, i: (0, 0)),
        ],
        out_specs=pl.BlockSpec((1, C), lambda bb, i: (bb, 0)),
        out_shape=jax.ShapeDtypeStruct((B, C), jnp.bfloat16),
        scratch_shapes=[pltpu.VMEM((1, C), jnp.float32)],
        compiler_params=pltpu.CompilerParams(
            dimension_semantics=("parallel", "arbitrary")),
    )(xp, w1, b1, w2, b2)


# ----------------------------------------------------------------------------
# Global average pool: [B, HW, C] bf16 -> [B, C] f32 (sublane-axis reduction)
# ----------------------------------------------------------------------------
def _pool_kernel(inv_hw, x_ref, o_ref):
    o_ref[...] = jnp.sum(x_ref[0].astype(jnp.float32), axis=0, keepdims=True) * inv_hw


@jax.jit
def global_avg_pool(x):
    B, HW, C = x.shape
    return pl.pallas_call(
        functools.partial(_pool_kernel, 1.0 / HW),
        grid=(B,),
        in_specs=[pl.BlockSpec((1, HW, C), lambda bb: (bb, 0, 0))],
        out_specs=pl.BlockSpec((1, C), lambda bb: (bb, 0)),
        out_shape=jax.ShapeDtypeStruct((B, C), jnp.float32),
        compiler_params=pltpu.CompilerParams(dimension_semantics=("parallel",)),
    )(x)


# ----------------------------------------------------------------------------
# Fused 4-layer classifier MLP (Linear/ReLU x3 + Linear); Dropout = identity (eval)
# ----------------------------------------------------------------------------
def _mlp_kernel(x_ref, w1, b1, w2, b2, w3, b3, w4, b4, o_ref):
    h = x_ref[...].astype(jnp.bfloat16)
    h = jnp.maximum(jnp.dot(h, w1[...], preferred_element_type=jnp.float32) + b1[...], 0.0)
    h = jnp.maximum(jnp.dot(h.astype(jnp.bfloat16), w2[...],
                            preferred_element_type=jnp.float32) + b2[...], 0.0)
    h = jnp.maximum(jnp.dot(h.astype(jnp.bfloat16), w3[...],
                            preferred_element_type=jnp.float32) + b3[...], 0.0)
    o_ref[...] = jnp.dot(h.astype(jnp.bfloat16), w4[...],
                         preferred_element_type=jnp.float32) + b4[...]


@jax.jit
def classifier_mlp(x, w1, b1, w2, b2, w3, b3, w4, b4):
    B = x.shape[0]
    nc = w4.shape[1]
    return pl.pallas_call(
        _mlp_kernel,
        out_shape=jax.ShapeDtypeStruct((B, nc), jnp.float32),
        in_specs=[_VMEM] * 9,
        out_specs=_VMEM,
    )(x, w1, b1, w2, b2, w3, b3, w4, b4)


# ----------------------------------------------------------------------------
# Plain-JAX glue (im2col / reshape only)
# ----------------------------------------------------------------------------
def _im2col(x, k, stride, pad, stack=False):
    B, H, W, C = x.shape
    xp = jnp.pad(x, ((0, 0), (pad, pad), (pad, pad), (0, 0)))
    Ho = (H + 2 * pad - k) // stride + 1
    Wo = (W + 2 * pad - k) // stride + 1
    patches = []
    for i in range(k):
        for j in range(k):
            patches.append(xp[:, i:i + stride * Ho:stride, j:j + stride * Wo:stride, :])
    if stack:
        return jnp.stack(patches, axis=0), Ho, Wo          # [k*k, B, Ho, Wo, C]
    return jnp.concatenate(patches, axis=-1), Ho, Wo        # [B, Ho, Wo, k*k*C]


def conv_bn_act(x, wf, bf, k, stride, act, residual=None):
    B, H, W, Cin = x.shape
    if k == 1:
        assert stride == 1
        a, Ho, Wo = x.reshape(B, H * W, Cin), H, W
    else:
        patches, Ho, Wo = _im2col(x, k, stride, (k - 1) // 2)
        a = patches.reshape(B, Ho * Wo, k * k * Cin)
    y = conv_matmul(a, wf, bf, residual=residual, act=act)
    return y.reshape(B, Ho, Wo, -1)


def dwconv_bn_act(x, w, b, k, stride):
    B, H, W, C = x.shape
    patches, Ho, Wo = _im2col(x, k, stride, (k - 1) // 2, stack=True)
    a = patches.reshape(k * k, B, Ho * Wo, C)
    y = depthwise_bias_act(a, w, b)
    return y.reshape(B, Ho, Wo, C)


def fused_mbconv_block(x, cfg, p):
    B, H, W, C = x.shape
    use_res = cfg["stride"] == 1 and cfg["cin"] == cfg["cout"]
    res = x.reshape(B, H * W, C) if use_res else None
    if cfg["expand"] == 1:
        return conv_bn_act(x, p["w"], p["b"], cfg["k"], cfg["stride"], "silu", residual=res)
    x1 = conv_bn_act(x, p["expand_w"], p["expand_b"], cfg["k"], cfg["stride"], "silu")
    Bo, Ho, Wo, Ce = x1.shape
    y = conv_matmul(x1.reshape(Bo, Ho * Wo, Ce), p["project_w"], p["project_b"],
                    residual=res, act="none")
    return y.reshape(Bo, Ho, Wo, -1)


def mbconv_block(x, cfg, p):
    B, H, W, C = x.shape
    use_res = cfg["stride"] == 1 and cfg["cin"] == cfg["cout"]
    res = x.reshape(B, H * W, C) if use_res else None
    x1 = conv_bn_act(x, p["expand_w"], p["expand_b"], 1, 1, "silu")
    x2 = dwconv_bn_act(x1, p["dw_w"], p["dw_b"], cfg["k"], cfg["stride"])
    Bo, Ho, Wo, Ce = x2.shape
    x2f = x2.reshape(Bo, Ho * Wo, Ce)
    s = squeeze_excite_gate(x2f, p["se_w1"], p["se_b1"], p["se_w2"], p["se_b2"])  # [B, Ce]
    y = conv_matmul(x2f, p["project_w"], p["project_b"],
                    scale=s[:, None, :], residual=res, act="none")
    return y.reshape(Bo, Ho, Wo, -1)


# ----------------------------------------------------------------------------
# Deterministic parameter construction (synthetic; no checkpoint load)
# ----------------------------------------------------------------------------
class KeyGen:
    def __init__(self, key):
        self.key = key

    def __call__(self):
        self.key, sub = jax.random.split(self.key)
        return sub


def init_conv_bn(kg, k, cin, cout):
    w = jax.random.normal(kg(), (k, k, cin, cout), jnp.float32) * np.sqrt(2.0 / (k * k * cin))
    gamma = 1.0 + 0.1 * jax.random.normal(kg(), (cout,), jnp.float32)
    beta = 0.1 * jax.random.normal(kg(), (cout,), jnp.float32)
    mean = 0.1 * jax.random.normal(kg(), (cout,), jnp.float32)
    var = 1.0 + 0.1 * jnp.abs(jax.random.normal(kg(), (cout,), jnp.float32))
    scale = gamma / jnp.sqrt(var + BN_EPS)
    shift = beta - mean * scale
    return (w * scale).reshape(k * k * cin, cout).astype(jnp.bfloat16), shift.astype(jnp.float32)


def init_dw_bn(kg, k, c):
    w = jax.random.normal(kg(), (k, k, c), jnp.float32) * np.sqrt(2.0 / (k * k))
    gamma = 1.0 + 0.1 * jax.random.normal(kg(), (c,), jnp.float32)
    beta = 0.1 * jax.random.normal(kg(), (c,), jnp.float32)
    mean = 0.1 * jax.random.normal(kg(), (c,), jnp.float32)
    var = 1.0 + 0.1 * jnp.abs(jax.random.normal(kg(), (c,), jnp.float32))
    scale = gamma / jnp.sqrt(var + BN_EPS)
    shift = beta - mean * scale
    return (w * scale).reshape(k * k, c), shift.astype(jnp.float32)


def init_linear(kg, cin, cout, wdtype):
    w = jax.random.normal(kg(), (cin, cout), jnp.float32) * np.sqrt(1.0 / cin)
    b = 0.01 * jax.random.normal(kg(), (1, cout), jnp.float32)
    return w.astype(wdtype), b


def build_params(num_classes, key):
    kg = KeyGen(key)
    blocks_cfg, blocks_p = [], []
    stem = init_conv_bn(kg, 3, 3, 24)
    for (expand, k, stride, cin, cout, layers, btype) in V2_S_CONFIG:
        for li in range(layers):
            s = stride if li == 0 else 1
            ci = cin if li == 0 else cout
            cfg = dict(type=btype, expand=expand, k=k, stride=s, cin=ci, cout=cout)
            p = {}
            if btype == "fused":
                if expand == 1:
                    p["w"], p["b"] = init_conv_bn(kg, k, ci, cout)
                else:
                    cexp = ci * expand
                    p["expand_w"], p["expand_b"] = init_conv_bn(kg, k, ci, cexp)
                    p["project_w"], p["project_b"] = init_conv_bn(kg, 1, cexp, cout)
            else:
                cexp = ci * expand
                csq = max(1, ci // 4)  # torchvision SE squeeze = input_channels // 4
                p["expand_w"], p["expand_b"] = init_conv_bn(kg, 1, ci, cexp)
                p["dw_w"], p["dw_b"] = init_dw_bn(kg, k, cexp)
                p["se_w1"], p["se_b1"] = init_linear(kg, cexp, csq, jnp.float32)
                p["se_w2"], p["se_b2"] = init_linear(kg, csq, cexp, jnp.float32)
                p["project_w"], p["project_b"] = init_conv_bn(kg, 1, cexp, cout)
            blocks_cfg.append(cfg)
            blocks_p.append(p)
    head = init_conv_bn(kg, 1, HEAD_IN, HEAD_OUT)
    # custom classifier head (size='S'):
    # Linear(1280,960) ReLU Dropout Linear(960,240) ReLU Dropout Linear(240,30) ReLU Dropout Linear(30,nc)
    classifier = [
        init_linear(kg, HEAD_OUT, 960, jnp.bfloat16),
        init_linear(kg, 960, 240, jnp.bfloat16),
        init_linear(kg, 240, 30, jnp.bfloat16),
        init_linear(kg, 30, num_classes, jnp.bfloat16),
    ]
    params = dict(stem=stem, blocks=blocks_p, head=head, classifier=classifier)
    return params, blocks_cfg


# ----------------------------------------------------------------------------
# Full forward (layout: NCHW in -> NHWC bf16 internally)
# ----------------------------------------------------------------------------
def efficientnet_v2_forward(params, blocks_cfg, x_nchw):
    x = jnp.transpose(x_nchw, (0, 2, 3, 1)).astype(jnp.bfloat16)
    w, b = params["stem"]
    x = conv_bn_act(x, w, b, 3, 2, "silu")
    for cfg, p in zip(blocks_cfg, params["blocks"]):
        x = fused_mbconv_block(x, cfg, p) if cfg["type"] == "fused" else mbconv_block(x, cfg, p)
    w, b = params["head"]
    x = conv_bn_act(x, w, b, 1, 1, "silu")
    B, H, W, C = x.shape
    pooled = global_avg_pool(x.reshape(B, H * W, C))        # adaptive avg pool -> [B, 1280] f32
    (w1, b1), (w2, b2), (w3, b3), (w4, b4) = params["classifier"]
    return classifier_mlp(pooled, w1, b1, w2, b2, w3, b3, w4, b4)


if __name__ == "__main__":
    num_classes = 4
    key = jax.random.PRNGKey(0)
    pkey, xkey = jax.random.split(key)
    params, blocks_cfg = build_params(num_classes, pkey)
    x = jax.random.normal(xkey, (2, 3, 32, 32), jnp.float32)  # NCHW input, small spatial
    out = efficientnet_v2_forward(params, blocks_cfg, x)
    out = jax.block_until_ready(out)
    assert out.shape == (2, num_classes), out.shape
    assert bool(jnp.all(jnp.isfinite(out)))
    print("KERNEL_OK")
</pallas_src>

<mosaic_0001>
module attributes {stable_mosaic.version = 11 : i64} {
  func.func @_conv_mm_kernel(%arg0: i32, %arg1: i32, %arg2: i32, %arg3: i32, %arg4: memref<1x256x27xbf16, #tpu.memory_space<vmem>>, %arg5: memref<27x24xbf16, #tpu.memory_space<vmem>>, %arg6: memref<1x1x24xf32, #tpu.memory_space<vmem>>, %arg7: memref<1x256x24xbf16, #tpu.memory_space<vmem>>, %arg8: memref<256x24xf32, #tpu.memory_space<vmem>>) attributes {dimension_semantics = [#tpu.dimension_semantics<parallel>, #tpu.dimension_semantics<parallel>, #tpu.dimension_semantics<parallel>, #tpu.dimension_semantics<arbitrary>], iteration_bounds = array<i64: 2, 1, 1, 1>, scalar_prefetch = 0 : i64, scratch_operands = 1 : i64, tpu.core_type = #tpu.core_type<tc>, window_params = [{transform_indices = @transform_0, window_bounds = array<i64: 1, 256, 27>}, {transform_indices = @transform_1, window_bounds = array<i64: 27, 24>}, {transform_indices = @transform_2, window_bounds = array<i64: 1, 1, 24>}, {transform_indices = @transform_3, window_bounds = array<i64: 1, 256, 24>}]} {
    %c0_i32 = arith.constant 0 : i32
    %0 = arith.cmpi eq, %arg3, %c0_i32 : i32
    %1 = arith.extui %0 : i1 to i32
    %c0_i32_0 = arith.constant 0 : i32
    %2 = arith.cmpi ne, %1, %c0_i32_0 : i32
    scf.if %2 {
      %cst_11 = arith.constant 0.000000e+00 : f32
      %13 = vector.broadcast %cst_11 : f32 to vector<256x24xf32>
      %c0_12 = arith.constant 0 : index
      %c0_13 = arith.constant 0 : index
      %14 = vector.load %arg8[%c0_12, %c0_13] : memref<256x24xf32, #tpu.memory_space<vmem>>, vector<256x24xf32>
      tpu.vector_store %arg8[%c0_12, %c0_13], %13 {strides = array<i32>} : memref<256x24xf32, #tpu.memory_space<vmem>>, vector<256x24xf32>,
    } else {
    }
    %c0 = arith.constant 0 : index
    %c0_1 = arith.constant 0 : index
    %c0_2 = arith.constant 0 : index
    %3 = vector.load %arg4[%c0, %c0_1, %c0_2] : memref<1x256x27xbf16, #tpu.memory_space<vmem>>, vector<1x256x27xbf16>
    %4 = vector.shape_cast %3 : vector<1x256x27xbf16> to vector<256x27xbf16>
    %c0_3 = arith.constant 0 : index
    %c0_4 = arith.constant 0 : index
    %5 = vector.load %arg8[%c0_3, %c0_4] : memref<256x24xf32, #tpu.memory_space<vmem>>, vector<256x24xf32>
    %c0_5 = arith.constant 0 : index
    %c0_6 = arith.constant 0 : index
    %6 = vector.load %arg5[%c0_5, %c0_6] : memref<27x24xbf16, #tpu.memory_space<vmem>>, vector<27x24xbf16>
    %cst = arith.constant dense<0.000000e+00> : vector<256x24xf32>
    %7 = tpu.matmul %4, %6, %cst {dimension_numbers = #tpu.dot_dimension_numbers<[1], [0], [0], [1], [0, 0, 1, 1], [], []>} : vector<256x27xbf16>, vector<27x24xbf16>, vector<256x24xf32> -> vector<256x24xf32>
    %8 = arith.addf %5, %7 : vector<256x24xf32>
    %c0_7 = arith.constant 0 : index
    %c0_8 = arith.constant 0 : index
    %9 = vector.load %arg8[%c0_7, %c0_8] : memref<256x24xf32, #tpu.memory_space<vmem>>, vector<256x24xf32>
    tpu.vector_store %arg8[%c0_7, %c0_8], %8 {strides = array<i32>} : memref<256x24xf32, #tpu.memory_space<vmem>>, vector<256x24xf32>,
    %c0_i32_9 = arith.constant 0 : i32
    %10 = arith.cmpi eq, %arg3, %c0_i32_9 : i32
    %11 = arith.extui %10 : i1 to i32
    %c0_i32_10 = arith.constant 0 : i32
    %12 = arith.cmpi ne, %11, %c0_i32_10 : i32
    scf.if %12 {
      %c0_11 = arith.constant 0 : index
      %c0_12 = arith.constant 0 : index
      %13 = vector.load %arg8[%c0_11, %c0_12] : memref<256x24xf32, #tpu.memory_space<vmem>>, vector<256x24xf32>
      %c0_13 = arith.constant 0 : index
      %c0_14 = arith.constant 0 : index
      %c0_15 = arith.constant 0 : index
      %14 = vector.load %arg6[%c0_13, %c0_14, %c0_15] : memref<1x1x24xf32, #tpu.memory_space<vmem>>, vector<1x1x24xf32>
      %15 = vector.shape_cast %14 : vector<1x1x24xf32> to vector<1x24xf32>
      %16 = vector.broadcast %15 : vector<1x24xf32> to vector<256x24xf32>
      %17 = arith.addf %13, %16 : vector<256x24xf32>
      %18 = arith.negf %17 : vector<256x24xf32>
      %19 = math.exp %18 : vector<256x24xf32>
      %cst_16 = arith.constant 1.000000e+00 : f32
      %20 = vector.broadcast %cst_16 : f32 to vector<256x24xf32>
      %21 = arith.addf %20, %19 : vector<256x24xf32>
      %22 = arith.divf %20, %21 : vector<256x24xf32>
      %23 = arith.mulf %17, %22 : vector<256x24xf32>
      %24 = arith.truncf %23 : vector<256x24xf32> to vector<256x24xbf16>
      %c0_17 = arith.constant 0 : index
      %c0_18 = arith.constant 0 : index
      %c0_19 = arith.constant 0 : index
      %25 = vector.load %arg7[%c0_17, %c0_18, %c0_19] : memref<1x256x24xbf16, #tpu.memory_space<vmem>>, vector<1x256x24xbf16>
      %26 = vector.shape_cast %25 : vector<1x256x24xbf16> to vector<256x24xbf16>
      %27 = vector.shape_cast %24 : vector<256x24xbf16> to vector<1x256x24xbf16>
      tpu.vector_store %arg7[%c0_17, %c0_18, %c0_19], %27 {strides = array<i32>} : memref<1x256x24xbf16, #tpu.memory_space<vmem>>, vector<1x256x24xbf16>,
    } else {
    }
    return
  }
  func.func @transform_0(%arg0: i32, %arg1: i32, %arg2: i32, %arg3: i32) -> (i32, i32, i32) {
    %c0_i32 = arith.constant 0 : i32
    return %arg0, %arg1, %arg3 : i32, i32, i32
  }
  func.func @transform_1(%arg0: i32, %arg1: i32, %arg2: i32, %arg3: i32) -> (i32, i32) {
    %c0_i32 = arith.constant 0 : i32
    return %arg3, %arg2 : i32, i32
  }
  func.func @transform_2(%arg0: i32, %arg1: i32, %arg2: i32, %arg3: i32) -> (i32, i32, i32) {
    %c0_i32 = arith.constant 0 : i32
    %c0_i32_0 = arith.constant 0 : i32
    %c0_i32_1 = arith.constant 0 : i32
    return %c0_i32, %c0_i32_0, %arg2 : i32, i32, i32
  }
  func.func @transform_3(%arg0: i32, %arg1: i32, %arg2: i32, %arg3: i32) -> (i32, i32, i32) {
    %c0_i32 = arith.constant 0 : i32
    return %arg0, %arg1, %arg2 : i32, i32, i32
  }
}

</mosaic_0001>

<bundles_post_ra>
// kernel: conv_matmul.1
= control target key start
LH: loop header
LB: loop body
LE: loop exit
PB: predicated region body
PF: predicated region fallthrough
CT: control target
= control target key end

     0   :  { %s1970_s12 = smov 0   ;;  %s1972_s13 = smov 0   ;;  %s2821_s0 = inlined_call_operand.vmem [shape: bf16[2,256,27], index: 0, kind: input, shape index: {}]   ;;  %s2822_s1 = inlined_call_operand.vmem [shape: bf16[27,24], index: 1, kind: input, shape index: {}]   ;;  %s2823_s2 = inlined_call_operand.vmem [shape: f32[1,1,24], index: 2, kind: input, shape index: {}]   ;;  %s2824_s3 = inlined_call_operand.vmem [shape: bf16[2,256,24], index: 3, kind: output, shape index: {}]  }
   0x1   :  { %s1974_s14 = smov 0  }
   0x2 LB: > { %s39_s15 = sadd.s32 1, %s1942_s13  ;;  %p1615_p0 = scmp.ge.s32.totalorder %s1946_s14, 1  ;;  %s1946_s14 = sphi %s1974_s14, %s13_s14   ;;  %s1942_s13 = sphi %s1972_s13, %s2879_s13   ;;  %s1938_s12 = sphi %s1970_s12, %s2878_s12  }
   0x3   : > { %p41_p1 = scmp.ge.s32.totalorder %s39_s15, 2  ;;  %p203_p2 = scmp.lt.s32.totalorder %s1946_s14, 3 }
   0x5   : > { %s2881_s15 = smov (%p41_p1, %s39_s15), 0  ;;  %p204_p3 = pnand %p1615_p0, %p203_p2 }
   0x6   : > { %p253_p4 = scmp.lt.s32.totalorder (!%p204_p3), %s1938_s12, 1 }
   0x7   : > { %207 = sbr.rel (%p204_p3) target bundleno = 351 (0x15f), region = 32 }
   0xc   : > { %v1690_v0 = vld [vmem:[%s2822_s1 + $0x8] sm:$0xf]  ;;  %v1761_v1 = vld [vmem:[%s2822_s1 + $0x8] sm:$0x30]  ;;  %vm536_vm0 = vcmask 1044480   ;;  %vm537_vm1 = vcmask 1045504  }
   0xd   : > { %v1691_v2 = vor.u32 %v1761_v1, %v1690_v0  ;;  %v1948_v3 = vmov 65535   ;;  %s2883_s12 = smov (!%p253_p4, %s1938_s12), 1  ;;  %v1760_v7 = vld [vmem:[%s2822_s1] sm:$0xff]  ;;  %vm487_vm2 = vcmask 220160   ;;  %vm2825_vm3 = vcmask 195584  }
   0xe   : > { %v538_v4 = vsel %vm536_vm0, 4294967295, %v1948_v3  ;;  %s1742_s20 = sshll.u32 %s2883_s12, 7  ;;  %v1949_v16 = vmov 0.0   ;;  %v2076_v35 = vld [vmem:[%s2823_s2] ss:$0 sm:$0xff]  ;;  %vm1440_vm9 = vcmask 191488  }
   0xf   : > { %v539_v5 = vsel %vm537_vm1, %v538_v4, 0  ;;  %s2005_s25 = scalar_lea.vmem %s2821_s0, %s1742_s20  ;;  %296 = vst.msk [vmem:[#allocation2] sm:$0xff] %vm2825_vm3, %v1949_v16  ;;  %s2202_s30 = scalar_lea.vmem %s2824_s3, %s1742_s20 }
  0x10   : > { %v541_v6 = vand.u32 %v1691_v2, %v539_v5  ;;  %v1744_v8 = vld [vmem:[%s2005_s25] sm:$0xff]  ;;  %v1745_v12 = vld [vmem:[%s2005_s25 + $0x8] sm:$0xff]  ;;  %297 = vst.msk [vmem:[#allocation2 + $0x8] sm:$0xff] %vm2825_vm3, %v1949_v16  ;;  %v1746_v17 = vld [vmem:[%s2005_s25 + $0x10] sm:$0xff] }
  0x11   : > { %v1748_v9 = vld [vmem:[%s2005_s25 + $0x20] sm:$0xff]  ;;  %v1749_v13 = vld [vmem:[%s2005_s25 + $0x28] sm:$0xff]  ;;  %298 = vst.msk [vmem:[#allocation2 + $0x10] sm:$0xff] %vm2825_vm3, %v1949_v16  ;;  %v1750_v18 = vld [vmem:[%s2005_s25 + $0x30] sm:$0xff] }
  0x12   : > { %549 = vmatpush.bf16.msra.mxu0 %v541_v6  ;;  %1762 = vmatpush.bf16.msra.mxu1 %v541_v6  ;;  %v1752_v10 = vld [vmem:[%s2005_s25 + $0x40] sm:$0xff]  ;;  %v1753_v14 = vld [vmem:[%s2005_s25 + $0x48] sm:$0xff]  ;;  %299 = vst.msk [vmem:[#allocation2 + $0x18] sm:$0xff] %vm2825_vm3, %v1949_v16  ;;  %v1754_v19 = vld [vmem:[%s2005_s25 + $0x50] sm:$0xff] }
  0x13   : > { %1763 = vmatpush.bf16.msra.mxu2 %v541_v6  ;;  %1764 = vmatpush.bf16.msra.mxu3 %v541_v6  ;;  %v1756_v11 = vld [vmem:[%s2005_s25 + $0x60] sm:$0xff]  ;;  %v1757_v15 = vld [vmem:[%s2005_s25 + $0x68] sm:$0xff]  ;;  %300 = vst.msk [vmem:[#allocation2 + $0x20] sm:$0xff] %vm2825_vm3, %v1949_v16  ;;  %v1758_v20 = vld [vmem:[%s2005_s25 + $0x70] sm:$0xff] }
  0x14   : > { %301 = vst.msk [vmem:[#allocation2 + $0x28] sm:$0xff] %vm2825_vm3, %v1949_v16  ;;  %v1747_v21 = vld [vmem:[%s2005_s25 + $0x18] sm:$0xff] }
  0x15   : > { %302 = vst.msk [vmem:[#allocation2 + $0x30] sm:$0xff] %vm2825_vm3, %v1949_v16  ;;  %v1751_v22 = vld [vmem:[%s2005_s25 + $0x38] sm:$0xff] }
  0x16   : > { %550 = vmatpush.bf16.msra.mxu0 %v1760_v7  ;;  %1765 = vmatpush.bf16.msra.mxu1 %v1760_v7  ;;  %303 = vst.msk [vmem:[#allocation2 + $0x38] sm:$0xff] %vm2825_vm3, %v1949_v16  ;;  %v1755_v23 = vld [vmem:[%s2005_s25 + $0x58] sm:$0xff]  ;;  %v360_v25 = vld [vmem:[#allocation2] sm:$0xff] }
  0x17   : > { %1766 = vmatpush.bf16.msra.mxu2 %v1760_v7  ;;  %1767 = vmatpush.bf16.msra.mxu3 %v1760_v7  ;;  %304 = vst.msk [vmem:[#allocation2 + $0x40] sm:$0xff] %vm2825_vm3, %v1949_v16  ;;  %v1759_v24 = vld [vmem:[%s2005_s25 + $0x78] sm:$0xff]  ;;  %v361_v33 = vld [vmem:[#allocation2 + $0x8] sm:$0xff] }
  0x18   : > { %305 = vst.msk [vmem:[#allocation2 + $0x48] sm:$0xff] %vm2825_vm3, %v1949_v16  ;;  %v362_v52 = vld [vmem:[#allocation2 + $0x10] sm:$0xff] }
  0x19   : > { %1692 = vmatmul.msk.bf16.vlgmr.msra.gmra.mxu0 %vm487_vm2, %v1744_v8  ;;  %1696 = vmatmul.msk.bf16.vlgmr.msra.gmra.mxu1 %vm487_vm2, %v1748_v9  ;;  %306 = vst.msk [vmem:[#allocation2 + $0x50] sm:$0xff] %vm2825_vm3, %v1949_v16 }
  0x1a   : > { %1700 = vmatmul.msk.bf16.vlgmr.msra.gmra.mxu2 %vm487_vm2, %v1752_v10  ;;  %1704 = vmatmul.msk.bf16.vlgmr.msra.gmra.mxu3 %vm487_vm2, %v1756_v11  ;;  %307 = vst.msk [vmem:[#allocation2 + $0x58] sm:$0xff] %vm2825_vm3, %v1949_v16 }
  0x1b   : > { %308 = vst.msk [vmem:[#allocation2 + $0x60] sm:$0xff] %vm2825_vm3, %v1949_v16 }
  0x1c   : > { %309 = vst.msk [vmem:[#allocation2 + $0x68] sm:$0xff] %vm2825_vm3, %v1949_v16 }
  0x1d   : > { %310 = vst.msk [vmem:[#allocation2 + $0x70] sm:$0xff] %vm2825_vm3, %v1949_v16 }
  0x1e   : > { %311 = vst.msk [vmem:[#allocation2 + $0x78] sm:$0xff] %vm2825_vm3, %v1949_v16  ;;  %v368_v26 = vld [vmem:[#allocation2 + $0x40] sm:$0xff] }
  0x1f   : > { %312 = vst.msk [vmem:[#allocation2 + $0x80] sm:$0xff] %vm2825_vm3, %v1949_v16  ;;  %v369_v34 = vld [vmem:[#allocation2 + $0x48] sm:$0xff] }
  0x20   : > { %313 = vst.msk [vmem:[#allocation2 + $0x88] sm:$0xff] %vm2825_vm3, %v1949_v16  ;;  %v370_v53 = vld [vmem:[#allocation2 + $0x50] sm:$0xff] }
  0x21   : > { %314 = vst.msk [vmem:[#allocation2 + $0x90] sm:$0xff] %vm2825_vm3, %v1949_v16 }
  0x22   : > { %315 = vst.msk [vmem:[#allocation2 + $0x98] sm:$0xff] %vm2825_vm3, %v1949_v16 }
  0x23   : > { %316 = vst.msk [vmem:[#allocation2 + $0xa0] sm:$0xff] %vm2825_vm3, %v1949_v16 }
  0x24   : > { %317 = vst.msk [vmem:[#allocation2 + $0xa8] sm:$0xff] %vm2825_vm3, %v1949_v16 }
  0x25   : > { %318 = vst.msk [vmem:[#allocation2 + $0xb0] sm:$0xff] %vm2825_vm3, %v1949_v16 }
  0x26   : > { %319 = vst.msk [vmem:[#allocation2 + $0xb8] sm:$0xff] %vm2825_vm3, %v1949_v16  ;;  %v376_v31 = vld [vmem:[#allocation2 + $0x80] sm:$0xff] }
  0x27   : > { %320 = vst.msk [vmem:[#allocation2 + $0xc0] sm:$0xff] %vm2825_vm3, %v1949_v16  ;;  %v377_v49 = vld [vmem:[#allocation2 + $0x88] sm:$0xff] }
  0x28   : > { %321 = vst.msk [vmem:[#allocation2 + $0xc8] sm:$0xff] %vm2825_vm3, %v1949_v16 }
  0x29   : > { %1693 = vmatmul.msk.bf16.gmra.mxu0 %vm487_vm2, %v1745_v12  ;;  %1697 = vmatmul.msk.bf16.gmra.mxu1 %vm487_vm2, %v1749_v13  ;;  %322 = vst.msk [vmem:[#allocation2 + $0xd0] sm:$0xff] %vm2825_vm3, %v1949_v16 }
  0x2a   : > { %1701 = vmatmul.msk.bf16.gmra.mxu2 %vm487_vm2, %v1753_v14  ;;  %1705 = vmatmul.msk.bf16.gmra.mxu3 %vm487_vm2, %v1757_v15  ;;  %323 = vst.msk [vmem:[#allocation2 + $0xd8] sm:$0xff] %vm2825_vm3, %v1949_v16  ;;  %v378_v15 = vld [vmem:[#allocation2 + $0x90] sm:$0xff] }
  0x2b   : > { %324 = vst.msk [vmem:[#allocation2 + $0xe0] sm:$0xff] %vm2825_vm3, %v1949_v16 }
  0x2c   : > { %325 = vst.msk [vmem:[#allocation2 + $0xe8] sm:$0xff] %vm2825_vm3, %v1949_v16 }
  0x2d   : > { %326 = vst.msk [vmem:[#allocation2 + $0xf0] sm:$0xff] %vm2825_vm3, %v1949_v16 }
  0x2e   : > { %327 = vst.msk [vmem:[#allocation2 + $0xf8] sm:$0xff] %vm2825_vm3, %v1949_v16  ;;  %v384_v32 = vld [vmem:[#allocation2 + $0xc0] sm:$0xff] }
  0x2f   : > { %v385_v50 = vld [vmem:[#allocation2 + $0xc8] sm:$0xff] }
  0x39   : > { %1694 = vmatmul.msk.bf16.gmra.mxu0 %vm487_vm2, %v1746_v17  ;;  %1698 = vmatmul.msk.bf16.gmra.mxu1 %vm487_vm2, %v1750_v18  ;;  %v386_v17 = vld [vmem:[#allocation2 + $0xd0] sm:$0xff] }
  0x3a   : > { %1702 = vmatmul.msk.bf16.gmra.mxu2 %vm487_vm2, %v1754_v19  ;;  %1706 = vmatmul.msk.bf16.gmra.mxu3 %vm487_vm2, %v1758_v20 }
  0x49   : > { %1695 = vmatmul.msk.bf16.gmra.mxu0 %vm487_vm2, %v1747_v21  ;;  %1699 = vmatmul.msk.bf16.gmra.mxu1 %vm487_vm2, %v1751_v22  ;;  %v363_v22 = vld [vmem:[#allocation2 + $0x18] sm:$0xff] }
  0x4a   : > { %1703 = vmatmul.msk.bf16.gmra.mxu2 %vm487_vm2, %v1755_v23  ;;  %1707 = vmatmul.msk.bf16.gmra.mxu3 %vm487_vm2, %v1759_v24 }
  0x96   : > { %v552_v27 = vpop.f32.mrf.mxu0  ;;  %v572_v28 = vpop.f32.mrf.mxu1 }
  0x97   : > { %v632_v29 = vadd.f32 %v552_v27, %v360_v25  ;;  %v640_v30 = vadd.f32 %v572_v28, %v368_v26  ;;  %v371_v27 = vld [vmem:[#allocation2 + $0x58] sm:$0xff] }
  0x99   : > { %665 = vst.msk [vmem:[#allocation2] sm:$0xff] %vm2825_vm3, %v632_v29 }
  0x9a   : > { %673 = vst.msk [vmem:[#allocation2 + $0x40] sm:$0xff] %vm2825_vm3, %v640_v30 }
  0x9d   : > { %v592_v36 = vpop.f32.mrf.mxu2  ;;  %v612_v37 = vpop.f32.mrf.mxu3 }
  0x9e   : > { %v648_v38 = vadd.f32 %v592_v36, %v376_v31  ;;  %v656_v39 = vadd.f32 %v612_v37, %v384_v32  ;;  %v554_v40 = vpop.f32.mrf.mxu0  ;;  %v574_v41 = vpop.f32.mrf.mxu1 }
  0x9f   : > { %v633_v42 = vadd.f32 %v554_v40, %v361_v33  ;;  %v641_v43 = vadd.f32 %v574_v41, %v369_v34 }
  0xa0   : > { %v700_v44 = vld [vmem:[#allocation2] sm:$0xff]  ;;  %681 = vst.msk [vmem:[#allocation2 + $0x80] sm:$0xff] %vm2825_vm3, %v648_v38 }
  0xa1   : > { %v2080_v45 = vadd.f32 %v2076_v35, %v700_v44  ;;  %v708_v46 = vld [vmem:[#allocation2 + $0x40] sm:$0xff]  ;;  %689 = vst.msk [vmem:[#allocation2 + $0xc0] sm:$0xff] %vm2825_vm3, %v656_v39 }
  0xa2   : > { %v2084_v47 = vadd.f32 %v2076_v35, %v708_v46  ;;  %666 = vst.msk [vmem:[#allocation2 + $0x8] sm:$0xff] %vm2825_vm3, %v633_v42 }
  0xa3   : > { %v1708_v48 = vmul.f32 -1.442695, %v2080_v45  ;;  %674 = vst.msk [vmem:[#allocation2 + $0x48] sm:$0xff] %vm2825_vm3, %v641_v43 }
  0xa4   : > { %v1716_v51 = vmul.f32 -1.442695, %v2084_v47 }
  0xa5   : > { %1795 = vpow2.f32 %v1708_v48  ;;  %v594_v54 = vpop.f32.mrf.mxu2  ;;  %v614_v55 = vpop.f32.mrf.mxu3 }
  0xa6   : > { %1797 = vpow2.f32 %v1716_v51  ;;  %v649_v56 = vadd.f32 %v594_v54, %v377_v49  ;;  %v657_v57 = vadd.f32 %v614_v55, %v385_v50  ;;  %v557_v58 = vpop.f32.mrf.mxu0  ;;  %v577_v59 = vpop.f32.mrf.mxu1 }
  0xa7   : > { %v716_v60 = vld [vmem:[#allocation2 + $0x80] sm:$0xff]  ;;  %v634_v61 = vadd.f32 %v557_v58, %v362_v52  ;;  %v642_v62 = vadd.f32 %v577_v59, %v370_v53 }
  0xa8   : > { %v2091_v63 = vadd.f32 %v2076_v35, %v716_v60  ;;  %v724_v0 = vld [vmem:[#allocation2 + $0xc0] sm:$0xff]  ;;  %682 = vst.msk [vmem:[#allocation2 + $0x88] sm:$0xff] %vm2825_vm3, %v649_v56 }
  0xa9   : > { %v2095_v1 = vadd.f32 %v2076_v35, %v724_v0  ;;  %v701_v2 = vld [vmem:[#allocation2 + $0x8] sm:$0xff]  ;;  %690 = vst.msk [vmem:[#allocation2 + $0xc8] sm:$0xff] %vm2825_vm3, %v657_v57 }
  0xaa   : > { %v1724_v3 = vmul.f32 -1.442695, %v2091_v63  ;;  %v2100_v4 = vadd.f32 %v2076_v35, %v701_v2  ;;  %v709_v5 = vld [vmem:[#allocation2 + $0x48] sm:$0xff]  ;;  %667 = vst.msk [vmem:[#allocation2 + $0x10] sm:$0xff] %vm2825_vm3, %v634_v61 }
  0xab   : > { %v1796_v6 = vpop.eup %1795  ;;  %v1732_v7 = vmul.f32 -1.442695, %v2095_v1  ;;  %v2105_v8 = vadd.f32 %v2076_v35, %v709_v5  ;;  %675 = vst.msk [vmem:[#allocation2 + $0x50] sm:$0xff] %vm2825_vm3, %v642_v62 }
  0xac   : > { %v1798_v9 = vpop.eup %1797  ;;  %v2108_v10 = vadd.f32 1.0, %v1796_v6  ;;  %1799 = vpow2.f32 %v1724_v3  ;;  %v1709_v11 = vmul.f32 -1.442695, %v2100_v4 }
  0xad   : > { %v2111_v12 = vadd.f32 1.0, %v1798_v9  ;;  %1801 = vpow2.f32 %v1732_v7  ;;  %v1717_v13 = vmul.f32 -1.442695, %v2105_v8  ;;  %v597_v16 = vpop.f32.mrf.mxu2  ;;  %v617_v18 = vpop.f32.mrf.mxu3 }
  0xae   : > { %1803 = vrcp.f32 %v2108_v10  ;;  %v905_v19 = vand.u32 2147483647, %v2108_v10  ;;  %v559_v23 = vpop.f32.mrf.mxu0  ;;  %v907_v24 = vand.u32 2147483648, %v2108_v10  ;;  %v579_v28 = vpop.f32.mrf.mxu1  ;;  %v650_v32 = vadd.f32 %v597_v16, %v378_v15 }
  0xaf   : > { %1805 = vrcp.f32 %v2111_v12  ;;  %v717_v14 = vld [vmem:[#allocation2 + $0x88] sm:$0xff]  ;;  %v1025_v25 = vand.u32 2147483647, %v2111_v12  ;;  %v1027_v26 = vand.u32 2147483648, %v2111_v12  ;;  %v658_v33 = vadd.f32 %v617_v18, %v386_v17 }
  0xb0   : > { %1807 = vpow2.f32 %v1709_v11  ;;  %v2118_v20 = vadd.f32 %v2076_v35, %v717_v14  ;;  %v725_v21 = vld [vmem:[#allocation2 + $0xc8] sm:$0xff]  ;;  %v635_v37 = vadd.f32 %v559_v23, %v363_v22  ;;  %vm901_vm4 = vweird.f32 %v2108_v10  ;;  %683 = vst.msk [vmem:[#allocation2 + $0x90] sm:$0xff] %vm2825_vm3, %v650_v32 }
  0xb1   : > { %1809 = vpow2.f32 %v1717_v13  ;;  %v2125_v31 = vadd.f32 %v2076_v35, %v725_v21  ;;  %vm1021_vm5 = vweird.f32 %v2111_v12  ;;  %v702_v40 = vld [vmem:[#allocation2 + $0x10] sm:$0xff]  ;;  %v643_v42 = vadd.f32 %v579_v28, %v371_v27  ;;  %691 = vst.msk [vmem:[#allocation2 + $0xd0] sm:$0xff] %vm2825_vm3, %v658_v33 }
  0xb2   : > { %v1800_v29 = vpop.eup %1799  ;;  %v1725_v30 = vmul.f32 -1.442695, %v2118_v20  ;;  %v710_v41 = vld [vmem:[#allocation2 + $0x50] sm:$0xff]  ;;  %vm2135_vm6 = vcmp.eq.f32.partialorder %v905_v19, 8.507059e+37  ;;  %v908_v48 = vor.u32 1.1754944e-38, %v907_v24  ;;  %vm2142_vm7 = vcmp.eq.f32.partialorder %v1025_v25, 8.507059e+37 }
  0xb3   : > { %v1802_v34 = vpop.eup %1801  ;;  %v2127_v36 = vadd.f32 1.0, %v1800_v29  ;;  %v1028_v52 = vor.u32 1.1754944e-38, %v1027_v26  ;;  %v1733_v53 = vmul.f32 -1.442695, %v2125_v31  ;;  %668 = vst.msk [vmem:[#allocation2 + $0x18] sm:$0xff] %vm2825_vm3, %v635_v37  ;;  %v2150_v56 = vadd.f32 %v2076_v35, %v702_v40 }
  0xb4   : > { %v1804_v38 = vpop.eup %1803  ;;  %v2131_v39 = vadd.f32 1.0, %v1802_v34  ;;  %v2153_v57 = vadd.f32 %v2076_v35, %v710_v41  ;;  %676 = vst.msk [vmem:[#allocation2 + $0x58] sm:$0xff] %vm2825_vm3, %v643_v42 }
  0xb5   : > { %v1806_v43 = vpop.eup %1805  ;;  %v897_v44 = vmul.f32 %v1804_v38, %v2108_v10  ;;  %1811 = vrcp.f32 %v2127_v36  ;;  %vm902_vm8 = vweird.f32 %v1804_v38  ;;  %v1145_v59 = vand.u32 2147483647, %v2127_v36 }
  0xb6   : > { %v1808_v49 = vpop.eup %1807  ;;  %v1017_v50 = vmul.f32 %v1806_v43, %v2111_v12  ;;  %1813 = vpow2.f32 %v1725_v30  ;;  %v1147_v60 = vand.u32 2147483648, %v2127_v36  ;;  %v1267_v62 = vand.u32 2147483648, %v2131_v39  ;;  %vm903_vm12 = vmor %vm901_vm4, %vm902_vm8 }
  0xb7   : > { %v1810_v54 = vpop.eup %1809  ;;  %v898_v55 = vsub.f32 1.0, %v897_v44  ;;  %1815 = vrcp.f32 %v2131_v39  ;;  %v2159_v0 = vadd.f32 1.0, %v1808_v49  ;;  %vm1022_vm10 = vweird.f32 %v1806_v43 }
  0xb8   : > { %v1018_v58 = vsub.f32 1.0, %v1017_v50  ;;  %v2161_v2 = vadd.f32 1.0, %v1810_v54  ;;  %v1265_v5 = vand.u32 2147483647, %v2131_v39  ;;  %1817 = vpow2.f32 %v1733_v53  ;;  %vm1023_vm15 = vmor %vm1021_vm5, %vm1022_vm10 }
  0xb9   : > { %v899_v61 = vmul.f32 %v1804_v38, %v898_v55  ;;  %vm1141_vm11 = vweird.f32 %v2127_v36  ;;  %1819 = vrcp.f32 %v2159_v0  ;;  %v2167_v9 = vmul.f32 -1.442695, %v2150_v56 }
  0xba   : > { %v1019_v3 = vmul.f32 %v1806_v43, %v1018_v58  ;;  %vm2173_vm13 = vcmp.eq.f32.partialorder %v1145_v59, 8.507059e+37  ;;  %v1148_v16 = vor.u32 1.1754944e-38, %v1147_v60  ;;  %vm1261_vm14 = vweird.f32 %v2131_v39  ;;  %v703_v25 = vld [vmem:[#allocation2 + $0x18] sm:$0xff] }
  0xbb   : > { %v1812_v6 = vpop.eup %1811  ;;  %v900_v7 = vadd.f32 %v1804_v38, %v899_v61  ;;  %v1268_v19 = vor.u32 1.1754944e-38, %v1267_v62  ;;  %v920_v10 = vand.u32 2147483647, %v2159_v0  ;;  %1821 = vrcp.f32 %v2161_v2 }
  0xbc   : > { %v1814_v11 = vpop.eup %1813  ;;  %v1020_v13 = vadd.f32 %v1806_v43, %v1019_v3  ;;  %v1137_v14 = vmul.f32 %v1812_v6, %v2127_v36  ;;  %vm2186_vm0 = vcmp.eq.f32.partialorder %v1265_v5, 8.507059e+37  ;;  %v922_v27 = vand.u32 2147483648, %v2159_v0 }
  0xbd   : > { %v1816_v17 = vpop.eup %1815  ;;  %v904_v18 = vsel %vm903_vm12, %v1804_v38, %v900_v7  ;;  %v2195_v28 = vmul.f32 -1.442695, %v2153_v57  ;;  %vm1142_vm1 = vweird.f32 %v1812_v6  ;;  %vm916_vm4 = vweird.f32 %v2159_v0 }
  0xbe   : > { %v909_v21 = vsel %vm2135_vm6, %v908_v48, %v904_v18  ;;  %v1024_v22 = vsel %vm1023_vm15, %v1806_v43, %v1020_v13  ;;  %v1138_v23 = vsub.f32 1.0, %v1137_v14  ;;  %v1257_v24 = vmul.f32 %v1816_v17, %v2131_v39  ;;  %v1818_v29 = vpop.eup %1817  ;;  %v726_v18 = vld [vmem:[#allocation2 + $0xd0] sm:$0xff] }
  0xbf   : > { %v1376_v26 = vmul.f32 %v909_v21, %v2080_v45  ;;  %v1029_v12 = vsel %vm2142_vm7, %v1028_v52, %v1024_v22  ;;  %v1820_v33 = vpop.eup %1819  ;;  %vm1262_vm2 = vweird.f32 %v1816_v17  ;;  %v2206_v37 = vadd.f32 1.0, %v1814_v11  ;;  %vm1143_vm7 = vmor %vm1141_vm11, %vm1142_vm1 }
  0xc0   : > { %v1384_v30 = vmul.f32 %v1029_v12, %v2084_v47  ;;  %v1139_v32 = vmul.f32 %v1812_v6, %v1138_v23  ;;  %v1258_v45 = vsub.f32 1.0, %v1257_v24  ;;  %v912_v42 = vmul.f32 %v1820_v33, %v2159_v0  ;;  %vm1263_vm8 = vmor %vm1261_vm14, %vm1262_vm2 }
  0xc1   : > { %v1408_v34 = vpack.c.bf16 %v1376_v26, %v1376_v26  ;;  %vm2209_vm5 = vcmp.eq.f32.partialorder %v920_v10, 8.507059e+37  ;;  %vm1036_vm6 = vweird.f32 %v2161_v2  ;;  %v1822_v47 = vpop.eup %1821  ;;  %v923_v44 = vor.u32 1.1754944e-38, %v922_v27  ;;  %v599_v26 = vpop.f32.mrf.mxu2 }
  0xc2   : > { %v1416_v38 = vpack.c.bf16 %v1384_v30, %v1384_v30  ;;  %v1140_v40 = vadd.f32 %v1812_v6, %v1139_v32  ;;  %v1259_v41 = vmul.f32 %v1816_v17, %v1258_v45  ;;  %v1040_v46 = vand.u32 2147483647, %v2161_v2  ;;  %v711_v30 = vld [vmem:[#allocation2 + $0x58] sm:$0xff] }
  0xc3   : > { %1441 = vst.msk [vmem:[%s2202_s30] sm:$0xf] %vm1440_vm9, %v1408_v34  ;;  %1823 = vrcp.f32 %v2206_v37  ;;  %v2221_v48 = vadd.f32 1.0, %v1818_v29  ;;  %v913_v51 = vsub.f32 1.0, %v912_v42  ;;  %v1032_v52 = vmul.f32 %v1822_v47, %v2161_v2  ;;  %v379_v34 = vld [vmem:[#allocation2 + $0x98] sm:$0xff] }
  0xc4   : > { %1449 = vst.msk [vmem:[%s2202_s30 + $0x20] sm:$0xf] %vm1440_vm9, %v1416_v38  ;;  %v1144_v49 = vsel %vm1143_vm7, %v1812_v6, %v1140_v40  ;;  %v1260_v50 = vadd.f32 %v1816_v17, %v1259_v41  ;;  %vm917_vm10 = vweird.f32 %v1820_v33  ;;  %v1042_v36 = vand.u32 2147483648, %v2161_v2  ;;  %v619_v2 = vpop.f32.mrf.mxu3  ;;  %v387_v38 = vld [vmem:[#allocation2 + $0xd8] sm:$0xff] }
  0xc5   : > { %v1149_v53 = vsel %vm2173_vm13, %v1148_v16, %v1144_v49  ;;  %v1160_v54 = vand.u32 2147483647, %v2206_v37  ;;  %v914_v59 = vmul.f32 %v1820_v33, %v913_v51  ;;  %v1033_v60 = vsub.f32 1.0, %v1032_v52  ;;  %vm918_vm12 = vmor %vm916_vm4, %vm917_vm10 }
  0xc6   : > { %v1392_v55 = vmul.f32 %v1149_v53, %v2091_v63  ;;  %v1264_v58 = vsel %vm1263_vm8, %v1816_v17, %v1260_v50  ;;  %vm1037_vm11 = vweird.f32 %v1822_v47  ;;  %v1162_v62 = vand.u32 2147483648, %v2206_v37  ;;  %v718_v17 = vld [vmem:[#allocation2 + $0x90] sm:$0xff]  ;;  %v380_v63 = vld [vmem:[#allocation2 + $0xa0] sm:$0xff] }
  0xc7   : > { %v1269_v61 = vsel %vm2186_vm0, %v1268_v19, %v1264_v58  ;;  %1825 = vrcp.f32 %v2221_v48  ;;  %v915_v5 = vadd.f32 %v1820_v33, %v914_v59  ;;  %v1034_v6 = vmul.f32 %v1822_v47, %v1033_v60  ;;  %vm1038_vm0 = vmor %vm1036_vm6, %vm1037_vm11 }
  0xc8   : > { %v1424_v39 = vpack.c.bf16 %v1392_v55, %v1392_v55  ;;  %v1400_v3 = vmul.f32 %v1269_v61, %v2095_v1  ;;  %vm2244_vm13 = vcmp.eq.f32.partialorder %v1040_v46, 8.507059e+37  ;;  %v1043_v11 = vor.u32 1.1754944e-38, %v1042_v36  ;;  %v562_v46 = vpop.f32.mrf.mxu0 }
  0xc9   : > { %v2239_v7 = vpop.eup %1823  ;;  %vm1156_vm14 = vweird.f32 %v2206_v37  ;;  %v1163_v13 = vor.u32 1.1754944e-38, %v1162_v62  ;;  %v919_v14 = vsel %vm918_vm12, %v1820_v33, %v915_v5  ;;  %v1035_v15 = vadd.f32 %v1822_v47, %v1034_v6  ;;  %v582_v5 = vpop.f32.mrf.mxu1 }
  0xca   : > { %1457 = vst.msk [vmem:[%s2202_s30 + $0x40] sm:$0xf] %vm1440_vm9, %v1424_v39  ;;  %v1432_v1 = vpack.c.bf16 %v1400_v3, %v1400_v3  ;;  %v1152_v16 = vmul.f32 %v2239_v7, %v2206_v37  ;;  %vm2253_vm15 = vcmp.eq.f32.partialorder %v1160_v54, 8.507059e+37  ;;  %v924_v19 = vsel %vm2209_vm5, %v923_v44, %v919_v14  ;;  %v364_v44 = vld [vmem:[#allocation2 + $0x20] sm:$0xff] }
  0xcb   : > { %vm1157_vm1 = vweird.f32 %v2239_v7  ;;  %v1280_v10 = vand.u32 2147483647, %v2221_v48  ;;  %v1282_v21 = vand.u32 2147483648, %v2221_v48  ;;  %v1377_v22 = vmul.f32 %v924_v19, %v2100_v4 }
  0xcc   : > { %1465 = vst.msk [vmem:[%s2202_s30 + $0x60] sm:$0xf] %vm1440_vm9, %v1432_v1  ;;  %v1039_v23 = vsel %vm1038_vm0, %v1822_v47, %v1035_v15  ;;  %v1153_v24 = vsub.f32 1.0, %v1152_v16  ;;  %vm1276_vm2 = vweird.f32 %v2221_v48  ;;  %1827 = vpow2.f32 %v2167_v9  ;;  %vm1158_vm5 = vmor %vm1156_vm14, %vm1157_vm1  ;;  %v622_v1 = vpop.f32.mrf.mxu3 }
  0xcd   : > { %v1826_v12 = vpop.eup %1825  ;;  %v1044_v27 = vsel %vm2244_vm13, %v1043_v11, %v1039_v23  ;;  %1829 = vpow2.f32 %v2195_v28  ;;  %v2274_v29 = vadd.f32 %v2076_v35, %v718_v17  ;;  %v2277_v4 = vadd.f32 %v2076_v35, %v726_v18  ;;  %v602_v11 = vpop.f32.mrf.mxu2 }
  0xce   : > { %v1409_v32 = vpack.c.bf16 %v1377_v22, %v1377_v22  ;;  %v1385_v9 = vmul.f32 %v1044_v27, %v2105_v8  ;;  %v1154_v45 = vmul.f32 %v2239_v7, %v1153_v24  ;;  %v1272_v33 = vmul.f32 %v1826_v12, %v2221_v48 }
  0xcf   : > { %vm1277_vm4 = vweird.f32 %v1826_v12  ;;  %v1726_v40 = vmul.f32 -1.442695, %v2274_v29  ;;  %v1734_v28 = vmul.f32 -1.442695, %v2277_v4  ;;  %v2285_v41 = vadd.f32 %v2076_v35, %v703_v25 }
  0xd0   : > { %1442 = vst.msk [vmem:[%s2202_s30 + $0x4] sm:$0xf] %vm1440_vm9, %v1409_v32  ;;  %v1417_v42 = vpack.c.bf16 %v1385_v9, %v1385_v9  ;;  %v1155_v8 = vadd.f32 %v2239_v7, %v1154_v45  ;;  %v1273_v43 = vsub.f32 1.0, %v1272_v33  ;;  %v2291_v47 = vadd.f32 %v2076_v35, %v711_v30  ;;  %vm2314_vm6 = vmor %vm1276_vm2, %vm1277_vm4 }
  0xd1   : > { %1831 = vpow2.f32 %v1726_v40  ;;  %v1711_v49 = vmul.f32 -1.442695, %v2285_v41  ;;  %v651_v50 = vadd.f32 %v599_v26, %v379_v34  ;;  %v659_v51 = vadd.f32 %v619_v2, %v387_v38 }
  0xd2   : > { %v1828_v52 = vpop.eup %1827  ;;  %1450 = vst.msk [vmem:[%s2202_s30 + $0x24] sm:$0xf] %vm1440_vm9, %v1417_v42  ;;  %v1159_v53 = vsel %vm1158_vm5, %v2239_v7, %v1155_v8  ;;  %v1274_v36 = vmul.f32 %v1826_v12, %v1273_v43  ;;  %1833 = vpow2.f32 %v1734_v28  ;;  %v1719_v54 = vmul.f32 -1.442695, %v2291_v47 }
  0xd3   : > { %v1830_v55 = vpop.eup %1829  ;;  %v1164_v58 = vsel %vm2253_vm15, %v1163_v13, %v1159_v53  ;;  %v2304_v37 = vadd.f32 1.0, %v1828_v52  ;;  %1835 = vpow2.f32 %v1711_v49  ;;  %684 = vst.msk [vmem:[#allocation2 + $0x98] sm:$0xff] %vm2825_vm3, %v651_v50  ;;  %v636_v59 = vadd.f32 %v562_v46, %v364_v44  ;;  %v388_v13 = vld [vmem:[#allocation2 + $0xe0] sm:$0xff] }
  0xd4   : > { %v1393_v60 = vmul.f32 %v1164_v58, %v2118_v20  ;;  %v1275_v61 = vadd.f32 %v1826_v12, %v1274_v36  ;;  %v2308_v62 = vadd.f32 1.0, %v1830_v55  ;;  %1837 = vpow2.f32 %v1719_v54  ;;  %692 = vst.msk [vmem:[#allocation2 + $0xd8] sm:$0xff] %vm2825_vm3, %v659_v51  ;;  %v372_v20 = vld [vmem:[#allocation2 + $0x60] sm:$0xff] }
  0xd5   : > { %v1283_v3 = vor.u32 1.1754944e-38, %v1282_v21  ;;  %1839 = vrcp.f32 %v2304_v37  ;;  %669 = vst.msk [vmem:[#allocation2 + $0x20] sm:$0xff] %vm2825_vm3, %v636_v59  ;;  %vm1281_vm7 = vcmp.eq.f32.partialorder %v1280_v10, 8.507059e+37  ;;  %v935_v16 = vand.u32 2147483647, %v2304_v37 }
  0xd6   : > { %v1425_v6 = vpack.c.bf16 %v1393_v60, %v1393_v60  ;;  %v1279_v7 = vsel %vm2314_vm6, %v1826_v12, %v1275_v61  ;;  %1841 = vrcp.f32 %v2308_v62  ;;  %v937_v18 = vand.u32 2147483648, %v2304_v37 }
  0xd7   : > { %v1832_v14 = vpop.eup %1831  ;;  %v1284_v15 = vsel %vm1281_vm7, %v1283_v3, %v1279_v7  ;;  %v644_v48 = vadd.f32 %v582_v5, %v372_v20  ;;  %v1055_v21 = vand.u32 2147483647, %v2308_v62  ;;  %v652_v23 = vadd.f32 %v602_v11, %v380_v63 }
  0xd8   : > { %v1834_v0 = vpop.eup %1833  ;;  %1458 = vst.msk [vmem:[%s2202_s30 + $0x44] sm:$0xf] %vm1440_vm9, %v1425_v6  ;;  %v1401_v17 = vmul.f32 %v1284_v15, %v2125_v31  ;;  %v2330_v19 = vadd.f32 1.0, %v1832_v14  ;;  %v660_v24 = vadd.f32 %v622_v1, %v388_v13  ;;  %v1057_v2 = vand.u32 2147483648, %v2308_v62 }
  0xd9   : > { %v1836_v10 = vpop.eup %1835  ;;  %v2333_v22 = vadd.f32 1.0, %v1834_v0  ;;  %677 = vst.msk [vmem:[#allocation2 + $0x60] sm:$0xff] %vm2825_vm3, %v644_v48  ;;  %vm931_vm8 = vweird.f32 %v2304_v37  ;;  %vm1051_vm10 = vweird.f32 %v2308_v62  ;;  %vm2345_vm11 = vcmp.eq.f32.partialorder %v935_v16, 8.507059e+37 }
  0xda   : > { %v1838_v25 = vpop.eup %1837  ;;  %v1433_v26 = vpack.c.bf16 %v1401_v17, %v1401_v17  ;;  %1843 = vrcp.f32 %v2330_v19  ;;  %685 = vst.msk [vmem:[#allocation2 + $0xa0] sm:$0xff] %vm2825_vm3, %v652_v23  ;;  %v1177_v32 = vand.u32 2147483648, %v2330_v19  ;;  %v938_v45 = vor.u32 1.1754944e-38, %v937_v18  ;;  %v719_v43 = vld [vmem:[#allocation2 + $0x98] sm:$0xff] }
  0xdb   : > { %v1840_v31 = vpop.eup %1839  ;;  %1845 = vrcp.f32 %v2333_v22  ;;  %v1297_v9 = vand.u32 2147483648, %v2333_v22  ;;  %vm2352_vm12 = vcmp.eq.f32.partialorder %v1055_v21, 8.507059e+37  ;;  %v1175_v38 = vand.u32 2147483647, %v2330_v19  ;;  %693 = vst.msk [vmem:[#allocation2 + $0xe0] sm:$0xff] %vm2825_vm3, %v660_v24  ;;  %v727_v49 = vld [vmem:[#allocation2 + $0xd8] sm:$0xff] }
  0xdc   : > { %v1842_v12 = vpop.eup %1841  ;;  %1466 = vst.msk [vmem:[%s2202_s30 + $0x64] sm:$0xf] %vm1440_vm9, %v1433_v26  ;;  %v927_v27 = vmul.f32 %v1840_v31, %v2304_v37  ;;  %v1058_v28 = vor.u32 1.1754944e-38, %v1057_v2  ;;  %v1295_v42 = vand.u32 2147483647, %v2333_v22  ;;  %v2359_v8 = vadd.f32 1.0, %v1836_v10 }
  0xdd   : > { %v1047_v33 = vmul.f32 %v1842_v12, %v2308_v62  ;;  %vm932_vm13 = vweird.f32 %v1840_v31  ;;  %vm1052_vm14 = vweird.f32 %v1842_v12  ;;  %vm1171_vm15 = vweird.f32 %v2330_v19  ;;  %v704_v30 = vld [vmem:[#allocation2 + $0x20] sm:$0xff] }
  0xde   : > { %v928_v40 = vsub.f32 1.0, %v927_v27  ;;  %v2362_v46 = vadd.f32 1.0, %v1838_v25  ;;  %v1178_v52 = vor.u32 1.1754944e-38, %v1177_v32  ;;  %vm1291_vm0 = vweird.f32 %v2333_v22  ;;  %vm933_vm4 = vmor %vm931_vm8, %vm932_vm13  ;;  %v564_v32 = vpop.f32.mrf.mxu0 }
  0xdf   : > { %v1048_v44 = vsub.f32 1.0, %v1047_v33  ;;  %v2365_v53 = vor.u32 1.1754944e-38, %v1297_v9  ;;  %1847 = vrcp.f32 %v2359_v8  ;;  %vm2371_vm1 = vcmp.eq.f32.partialorder %v1175_v38, 8.507059e+37  ;;  %vm1053_vm6 = vmor %vm1051_vm10, %vm1052_vm14 }
  0xe0   : > { %v1844_v50 = vpop.eup %1843  ;;  %v929_v51 = vmul.f32 %v1840_v31, %v928_v40  ;;  %v952_v59 = vand.u32 2147483648, %v2359_v8  ;;  %v2377_v60 = vadd.f32 %v2076_v35, %v719_v43  ;;  %vm2381_vm2 = vcmp.eq.f32.partialorder %v1295_v42, 8.507059e+37  ;;  %v712_v34 = vld [vmem:[#allocation2 + $0x60] sm:$0xff]  ;;  %v584_v40 = vpop.f32.mrf.mxu1 }
  0xe1   : > { %v2368_v36 = vpop.eup %1845  ;;  %v1049_v54 = vmul.f32 %v1842_v12, %v1048_v44  ;;  %v1167_v55 = vmul.f32 %v1844_v50, %v2330_v19  ;;  %v950_v20 = vand.u32 2147483647, %v2359_v8  ;;  %v2387_v5 = vadd.f32 %v2076_v35, %v727_v49  ;;  %v720_v38 = vld [vmem:[#allocation2 + $0xa0] sm:$0xff]  ;;  %v604_v49 = vpop.f32.mrf.mxu2 }
  0xe2   : > { %v930_v61 = vadd.f32 %v1840_v31, %v929_v51  ;;  %v1287_v39 = vmul.f32 %v2368_v36, %v2333_v22  ;;  %vm1172_vm5 = vweird.f32 %v1844_v50  ;;  %1849 = vrcp.f32 %v2362_v46  ;;  %v728_v44 = vld [vmem:[#allocation2 + $0xe0] sm:$0xff] }
  0xe3   : > { %v1050_v6 = vadd.f32 %v1842_v12, %v1049_v54  ;;  %v1168_v7 = vsub.f32 1.0, %v1167_v55  ;;  %vm1292_vm7 = vweird.f32 %v2368_v36  ;;  %v2397_v13 = vor.u32 1.1754944e-38, %v952_v59  ;;  %v365_v54 = vld [vmem:[#allocation2 + $0x28] sm:$0xff] }
  0xe4   : > { %v934_v63 = vsel %vm933_vm4, %v1840_v31, %v930_v61  ;;  %v1288_v11 = vsub.f32 1.0, %v1287_v39  ;;  %vm946_vm8 = vweird.f32 %v2359_v8  ;;  %v1072_v15 = vand.u32 2147483648, %v2362_v46  ;;  %vm2432_vm14 = vmor %vm1291_vm0, %vm1292_vm7  ;;  %v373_v59 = vld [vmem:[#allocation2 + $0x68] sm:$0xff] }
  0xe5   : > { %v939_v1 = vsel %vm2345_vm11, %v938_v45, %v934_v63  ;;  %v1054_v37 = vsel %vm1053_vm6, %v1842_v12, %v1050_v6  ;;  %v1169_v14 = vmul.f32 %v1844_v50, %v1168_v7  ;;  %v2403_v16 = vpop.eup %1847  ;;  %v1070_v18 = vand.u32 2147483647, %v2362_v46  ;;  %v389_v6 = vld [vmem:[#allocation2 + $0xe8] sm:$0xff] }
  0xe6   : > { %v1378_v0 = vmul.f32 %v939_v1, %v2150_v56  ;;  %v1059_v62 = vsel %vm2352_vm12, %v1058_v28, %v1054_v37  ;;  %v1289_v17 = vmul.f32 %v2368_v36, %v1288_v11  ;;  %v942_v21 = vmul.f32 %v2403_v16, %v2359_v8  ;;  %vm1173_vm12 = vmor %vm1171_vm15, %vm1172_vm5 }
  0xe7   : > { %v1386_v48 = vmul.f32 %v1059_v62, %v2153_v57  ;;  %v1170_v10 = vadd.f32 %v1844_v50, %v1169_v14  ;;  %vm947_vm10 = vweird.f32 %v2403_v16  ;;  %vm2414_vm11 = vcmp.eq.f32.partialorder %v950_v20, 8.507059e+37  ;;  %v381_v20 = vld [vmem:[#allocation2 + $0xa8] sm:$0xff] }
  0xe8   : > { %v1410_v56 = vpack.c.bf16 %v1378_v0, %v1378_v0  ;;  %v1290_v24 = vadd.f32 %v2368_v36, %v1289_v17  ;;  %vm1066_vm13 = vweird.f32 %v2362_v46  ;;  %v2423_v57 = vor.u32 1.1754944e-38, %v1072_v15  ;;  %v2426_v26 = vpop.eup %1849 }
  0xe9   : > { %v1727_v25 = vmul.f32 -1.442695, %v2377_v60  ;;  %v1418_v2 = vpack.c.bf16 %v1386_v48, %v1386_v48  ;;  %v1174_v31 = vsel %vm1173_vm12, %v1844_v50, %v1170_v10  ;;  %v943_v12 = vsub.f32 1.0, %v942_v21  ;;  %v624_v50 = vpop.f32.mrf.mxu3  ;;  %v366_v10 = vld [vmem:[#allocation2 + $0x30] sm:$0xff]  ;;  %v567_v21 = vpop.f32.mrf.mxu0 }
  0xea   : > { %v1735_v27 = vmul.f32 -1.442695, %v2387_v5  ;;  %1443 = vst.msk [vmem:[%s2202_s30 + $0x8] sm:$0xf] %vm1440_vm9, %v1410_v56  ;;  %v1179_v9 = vsel %vm2371_vm1, %v1178_v52, %v1174_v31  ;;  %v1294_v45 = vsel %vm2432_vm14, %v2368_v36, %v1290_v24  ;;  %v1062_v22 = vmul.f32 %v2426_v26, %v2362_v46  ;;  %vm948_vm1 = vmor %vm946_vm8, %vm947_vm10  ;;  %v374_v56 = vld [vmem:[#allocation2 + $0x70] sm:$0xff]  ;;  %v587_v24 = vpop.f32.mrf.mxu1 }
  0xeb   : > { %vm1067_vm15 = vweird.f32 %v2426_v26  ;;  %vm2447_vm0 = vcmp.eq.f32.partialorder %v1070_v18, 8.507059e+37  ;;  %1451 = vst.msk [vmem:[%s2202_s30 + $0x28] sm:$0xf] %vm1440_vm9, %v1418_v2  ;;  %v1394_v28 = vmul.f32 %v1179_v9, %v2274_v29  ;;  %v1299_v42 = vsel %vm2381_vm2, %v2365_v53, %v1294_v45 }
  0xec   : > { %v944_v43 = vmul.f32 %v2403_v16, %v943_v12  ;;  %1851 = vpow2.f32 %v1727_v25  ;;  %v1402_v51 = vmul.f32 %v1299_v42, %v2277_v4  ;;  %v1063_v52 = vsub.f32 1.0, %v1062_v22  ;;  %vm1068_vm2 = vmor %vm1066_vm13, %vm1067_vm15  ;;  %v607_v25 = vpop.f32.mrf.mxu2 }
  0xed   : > { %1853 = vpow2.f32 %v1735_v27  ;;  %v2460_v36 = vadd.f32 %v2076_v35, %v704_v30  ;;  %v1426_v29 = vpack.c.bf16 %v1394_v28, %v1394_v28  ;;  %v2464_v53 = vadd.f32 %v2076_v35, %v712_v34 }
  0xee   : > { %v945_v55 = vadd.f32 %v2403_v16, %v944_v43  ;;  %v2467_v58 = vadd.f32 %v2076_v35, %v720_v38  ;;  %v1434_v61 = vpack.c.bf16 %v1402_v51, %v1402_v51  ;;  %v1064_v4 = vmul.f32 %v2426_v26, %v1063_v52 }
  0xef   : > { %v1712_v39 = vmul.f32 -1.442695, %v2460_v36  ;;  %v2476_v3 = vadd.f32 %v2076_v35, %v728_v44  ;;  %1459 = vst.msk [vmem:[%s2202_s30 + $0x48] sm:$0xf] %vm1440_vm9, %v1426_v29  ;;  %v1720_v63 = vmul.f32 -1.442695, %v2464_v53  ;;  %v637_v1 = vadd.f32 %v564_v32, %v365_v54 }
  0xf0   : > { %v949_v7 = vsel %vm948_vm1, %v2403_v16, %v945_v55  ;;  %v1728_v11 = vmul.f32 -1.442695, %v2467_v58  ;;  %1467 = vst.msk [vmem:[%s2202_s30 + $0x68] sm:$0xf] %vm1440_vm9, %v1434_v61  ;;  %v1065_v35 = vadd.f32 %v2426_v26, %v1064_v4  ;;  %v645_v16 = vadd.f32 %v584_v40, %v373_v59 }
  0xf1   : > { %v954_v8 = vsel %vm2414_vm11, %v2397_v13, %v949_v7  ;;  %1855 = vpow2.f32 %v1712_v39  ;;  %v1736_v37 = vmul.f32 -1.442695, %v2476_v3  ;;  %670 = vst.msk [vmem:[#allocation2 + $0x28] sm:$0xff] %vm2825_vm3, %v637_v1  ;;  %v653_v0 = vadd.f32 %v604_v49, %v381_v20  ;;  %v627_v2 = vpop.f32.mrf.mxu3 }
  0xf2   : > { %v1852_v14 = vpop.eup %1851  ;;  %v1379_v15 = vmul.f32 %v954_v8, %v2285_v41  ;;  %1857 = vpow2.f32 %v1720_v63  ;;  %v1069_v13 = vsel %vm1068_vm2, %v2426_v26, %v1065_v35  ;;  %v661_v18 = vadd.f32 %v624_v50, %v389_v6  ;;  %678 = vst.msk [vmem:[#allocation2 + $0x68] sm:$0xff] %vm2825_vm3, %v645_v16  ;;  %v390_v26 = vld [vmem:[#allocation2 + $0xf0] sm:$0xff] }
  0xf3   : > { %v1854_v62 = vpop.eup %1853  ;;  %v2497_v17 = vadd.f32 1.0, %v1852_v14  ;;  %1859 = vpow2.f32 %v1728_v11  ;;  %v1074_v41 = vsel %vm2447_vm0, %v2423_v57, %v1069_v13  ;;  %686 = vst.msk [vmem:[#allocation2 + $0xa8] sm:$0xff] %vm2825_vm3, %v653_v0  ;;  %v382_v57 = vld [vmem:[#allocation2 + $0xb0] sm:$0xff]  ;;  %v646_v45 = vadd.f32 %v587_v24, %v374_v56 }
  0xf4   : > { %v1411_v48 = vpack.c.bf16 %v1379_v15, %v1379_v15  ;;  %v2502_v46 = vadd.f32 1.0, %v1854_v62  ;;  %1861 = vpow2.f32 %v1736_v37  ;;  %v1387_v23 = vmul.f32 %v1074_v41, %v2291_v47  ;;  %694 = vst.msk [vmem:[#allocation2 + $0xe8] sm:$0xff] %vm2825_vm3, %v661_v18  ;;  %v2554_v15 = vld [vmem:[%s2823_s2] ss:$0 sm:$0xff] }
  0xf5   : > { %1863 = vrcp.f32 %v2497_v17  ;;  %v1190_v12 = vand.u32 2147483647, %v2497_v17  ;;  %v638_v47 = vadd.f32 %v567_v21, %v366_v10  ;;  %v1192_v30 = vand.u32 2147483648, %v2497_v17  ;;  %679 = vst.msk [vmem:[#allocation2 + $0x70] sm:$0xff] %vm2825_vm3, %v646_v45 }
  0xf6   : > { %1444 = vst.msk [vmem:[%s2202_s30 + $0xc] sm:$0xf] %vm1440_vm9, %v1411_v48  ;;  %1865 = vrcp.f32 %v2502_v46  ;;  %v1419_v19 = vpack.c.bf16 %v1387_v23, %v1387_v23  ;;  %v1310_v32 = vand.u32 2147483647, %v2502_v46  ;;  %v1312_v33 = vand.u32 2147483648, %v2502_v46 }
  0xf7   : > { %v1856_v31 = vpop.eup %1855  ;;  %v654_v38 = vadd.f32 %v607_v25, %v382_v57  ;;  %v662_v40 = vadd.f32 %v627_v2, %v390_v26  ;;  %671 = vst.msk [vmem:[#allocation2 + $0x30] sm:$0xff] %vm2825_vm3, %v638_v47  ;;  %vm1186_vm4 = vweird.f32 %v2497_v17  ;;  %vm1306_vm5 = vweird.f32 %v2502_v46 }
  0xf8   : > { %v1858_v27 = vpop.eup %1857  ;;  %v2515_v9 = vadd.f32 1.0, %v1856_v31  ;;  %1452 = vst.msk [vmem:[%s2202_s30 + $0x2c] sm:$0xf] %vm1440_vm9, %v1419_v19  ;;  %vm2530_vm6 = vcmp.eq.f32.partialorder %v1190_v12, 8.507059e+37  ;;  %v1193_v51 = vor.u32 1.1754944e-38, %v1192_v30  ;;  %vm2537_vm7 = vcmp.eq.f32.partialorder %v1310_v32, 8.507059e+37 }
  0xf9   : > { %v1860_v22 = vpop.eup %1859  ;;  %v2520_v34 = vadd.f32 1.0, %v1858_v27  ;;  %687 = vst.msk [vmem:[#allocation2 + $0xb0] sm:$0xff] %vm2825_vm3, %v654_v38  ;;  %v1313_v55 = vor.u32 1.1754944e-38, %v1312_v33  ;;  %v705_v61 = vld [vmem:[#allocation2 + $0x28] sm:$0xff] }
  0xfa   : > { %v1862_v28 = vpop.eup %1861  ;;  %1867 = vrcp.f32 %v2515_v9  ;;  %v967_v43 = vand.u32 2147483648, %v2515_v9  ;;  %vm961_vm8 = vweird.f32 %v2515_v9  ;;  %v965_v59 = vand.u32 2147483647, %v2515_v9  ;;  %695 = vst.msk [vmem:[#allocation2 + $0xf0] sm:$0xff] %vm2825_vm3, %v662_v40  ;;  %v713_v6 = vld [vmem:[#allocation2 + $0x68] sm:$0xff] }
  0xfb   : > { %v1864_v42 = vpop.eup %1863  ;;  %1869 = vrcp.f32 %v2520_v34  ;;  %v1087_v52 = vand.u32 2147483648, %v2520_v34  ;;  %vm1081_vm11 = vweird.f32 %v2520_v34  ;;  %v1085_v39 = vand.u32 2147483647, %v2520_v34  ;;  %v721_v1 = vld [vmem:[#allocation2 + $0xa8] sm:$0xff] }
  0xfc   : > { %v1866_v44 = vpop.eup %1865  ;;  %v1182_v49 = vmul.f32 %v1864_v42, %v2497_v17  ;;  %vm1187_vm10 = vweird.f32 %v1864_v42  ;;  %v2546_v20 = vadd.f32 1.0, %v1860_v22  ;;  %v968_v63 = vor.u32 1.1754944e-38, %v967_v43  ;;  %v729_v8 = vld [vmem:[#allocation2 + $0xe8] sm:$0xff] }
  0xfd   : > { %v1302_v54 = vmul.f32 %v1866_v44, %v2502_v46  ;;  %vm1307_vm12 = vweird.f32 %v1866_v44  ;;  %v2548_v11 = vadd.f32 1.0, %v1862_v28  ;;  %v1088_v14 = vor.u32 1.1754944e-38, %v1087_v52  ;;  %vm1188_vm15 = vmor %vm1186_vm4, %vm1187_vm10 }
  0xfe   : > { %v1183_v4 = vsub.f32 1.0, %v1182_v49  ;;  %1871 = vrcp.f32 %v2546_v20  ;;  %v2557_v16 = vadd.f32 %v2554_v15, %v705_v61  ;;  %vm2560_vm13 = vcmp.eq.f32.partialorder %v965_v59, 8.507059e+37  ;;  %vm1308_vm0 = vmor %vm1306_vm5, %vm1307_vm12  ;;  %v706_v29 = vld [vmem:[#allocation2 + $0x30] sm:$0xff] }
  0xff   : > { %v1303_v7 = vsub.f32 1.0, %v1302_v54  ;;  %v1207_v48 = vand.u32 2147483648, %v2546_v20  ;;  %v2566_v41 = vadd.f32 %v2554_v15, %v713_v6  ;;  %vm2569_vm14 = vcmp.eq.f32.partialorder %v1085_v39, 8.507059e+37  ;;  %v714_v61 = vld [vmem:[#allocation2 + $0x70] sm:$0xff] }
 0x100   : > { %v1868_v35 = vpop.eup %1867  ;;  %v1184_v37 = vmul.f32 %v1864_v42, %v1183_v4  ;;  %v2574_v56 = vadd.f32 %v2554_v15, %v721_v1  ;;  %v2577_v24 = vadd.f32 %v2554_v15, %v729_v8  ;;  %v1205_v26 = vand.u32 2147483647, %v2546_v20 }
 0x101   : > { %v1870_v0 = vpop.eup %1869  ;;  %v1304_v62 = vmul.f32 %v1866_v44, %v1303_v7  ;;  %v957_v13 = vmul.f32 %v1868_v35, %v2515_v9  ;;  %1873 = vrcp.f32 %v2548_v11  ;;  %vm962_vm1 = vweird.f32 %v1868_v35  ;;  %v722_v7 = vld [vmem:[#allocation2 + $0xb0] sm:$0xff] }
 0x102   : > { %v1185_v10 = vadd.f32 %v1864_v42, %v1184_v37  ;;  %v1077_v21 = vmul.f32 %v1870_v0, %v2520_v34  ;;  %vm1082_vm2 = vweird.f32 %v1870_v0  ;;  %vm1201_vm4 = vweird.f32 %v2546_v20 }
 0x103   : > { %v1305_v57 = vadd.f32 %v1866_v44, %v1304_v62  ;;  %v958_v25 = vsub.f32 1.0, %v957_v13  ;;  %v1208_v47 = vor.u32 1.1754944e-38, %v1207_v48  ;;  %v1325_v46 = vand.u32 2147483647, %v2548_v11  ;;  %vm1083_vm12 = vmor %vm1081_vm11, %vm1082_vm2  ;;  %v730_v48 = vld [vmem:[#allocation2 + $0xf0] sm:$0xff] }
 0x104   : > { %v1189_v2 = vsel %vm1188_vm15, %v1864_v42, %v1185_v10  ;;  %v1078_v31 = vsub.f32 1.0, %v1077_v21  ;;  %v1872_v27 = vpop.eup %1871  ;;  %vm2596_vm5 = vcmp.eq.f32.partialorder %v1205_v26, 8.507059e+37  ;;  %v1327_v28 = vand.u32 2147483648, %v2548_v11 }
 0x105   : > { %v1194_v19 = vsel %vm2530_vm6, %v1193_v51, %v1189_v2  ;;  %v1309_v12 = vsel %vm1308_vm0, %v1866_v44, %v1305_v57  ;;  %v959_v17 = vmul.f32 %v1868_v35, %v958_v25  ;;  %v1197_v38 = vmul.f32 %v1872_v27, %v2546_v20  ;;  %vm963_vm6 = vmor %vm961_vm8, %vm962_vm1 }
 0x106   : > { %v1395_v30 = vmul.f32 %v1194_v19, %v2377_v60  ;;  %v1314_v32 = vsel %vm2537_vm7, %v1313_v55, %v1309_v12  ;;  %v1079_v45 = vmul.f32 %v1870_v0, %v1078_v31  ;;  %vm1202_vm7 = vweird.f32 %v1872_v27 }
 0x107   : > { %v1403_v22 = vmul.f32 %v1314_v32, %v2387_v5  ;;  %v960_v33 = vadd.f32 %v1868_v35, %v959_v17  ;;  %vm1321_vm10 = vweird.f32 %v2548_v11  ;;  %v1713_v5 = vmul.f32 -1.442695, %v2557_v16  ;;  %v1874_v43 = vpop.eup %1873  ;;  %vm1203_vm11 = vmor %vm1201_vm4, %vm1202_vm7 }
 0x108   : > { %v1427_v42 = vpack.c.bf16 %v1395_v30, %v1395_v30  ;;  %v1080_v60 = vadd.f32 %v1870_v0, %v1079_v45  ;;  %v1198_v50 = vsub.f32 1.0, %v1197_v38  ;;  %v1721_v51 = vmul.f32 -1.442695, %v2566_v41 }
 0x109   : > { %v1435_v44 = vpack.c.bf16 %v1403_v22, %v1403_v22  ;;  %v964_v49 = vsel %vm963_vm6, %v1868_v35, %v960_v33  ;;  %v1317_v54 = vmul.f32 %v1874_v43, %v2548_v11  ;;  %vm1322_vm8 = vweird.f32 %v1874_v43 }
 0x10a   : > { %1460 = vst.msk [vmem:[%s2202_s30 + $0x4c] sm:$0xf] %vm1440_vm9, %v1427_v42  ;;  %v969_v9 = vsel %vm2560_vm13, %v968_v63, %v964_v49  ;;  %v1084_v52 = vsel %vm1083_vm12, %v1870_v0, %v1080_v60  ;;  %v1199_v59 = vmul.f32 %v1872_v27, %v1198_v50  ;;  %1875 = vpow2.f32 %v1713_v5  ;;  %v569_v0 = vpop.f32.mrf.mxu0 }
 0x10b   : > { %1468 = vst.msk [vmem:[%s2202_s30 + $0x6c] sm:$0xf] %vm1440_vm9, %v1435_v44  ;;  %v1380_v55 = vmul.f32 %v969_v9, %v2460_v36  ;;  %v1089_v34 = vsel %vm2569_vm14, %v1088_v14, %v1084_v52  ;;  %v1318_v39 = vsub.f32 1.0, %v1317_v54  ;;  %1877 = vpow2.f32 %v1721_v51  ;;  %v367_v14 = vld [vmem:[#allocation2 + $0x38] sm:$0xff]  ;;  %vm1323_vm14 = vmor %vm1321_vm10, %vm1322_vm8 }
 0x10c   : > { %v1388_v4 = vmul.f32 %v1089_v34, %v2464_v53  ;;  %v1729_v6 = vmul.f32 -1.442695, %v2574_v56  ;;  %v1200_v1 = vadd.f32 %v1872_v27, %v1199_v59  ;;  %v1737_v8 = vmul.f32 -1.442695, %v2577_v24 }
 0x10d   : > { %v1412_v63 = vpack.c.bf16 %v1380_v55, %v1380_v55  ;;  %v2624_v36 = vadd.f32 %v2554_v15, %v706_v29  ;;  %v1319_v53 = vmul.f32 %v1874_v43, %v1318_v39  ;;  %v2630_v37 = vadd.f32 %v2554_v15, %v714_v61 }
 0x10e   : > { %v1420_v35 = vpack.c.bf16 %v1388_v4, %v1388_v4  ;;  %1879 = vpow2.f32 %v1729_v6  ;;  %v1204_v62 = vsel %vm1203_vm11, %v1872_v27, %v1200_v1  ;;  %v2636_v18 = vadd.f32 %v2554_v15, %v722_v7 }
 0x10f   : > { %1445 = vst.msk [vmem:[%s2202_s30 + $0x10] sm:$0xf] %vm1440_vm9, %v1412_v63  ;;  %1881 = vpow2.f32 %v1737_v8  ;;  %v1714_v13 = vmul.f32 -1.442695, %v2624_v36  ;;  %v1209_v20 = vsel %vm2596_vm5, %v1208_v47, %v1204_v62  ;;  %v1320_v10 = vadd.f32 %v1874_v43, %v1319_v53  ;;  %v383_v53 = vld [vmem:[#allocation2 + $0xb8] sm:$0xff] }
 0x110   : > { %1453 = vst.msk [vmem:[%s2202_s30 + $0x30] sm:$0xf] %vm1440_vm9, %v1420_v35  ;;  %vm1326_vm13 = vcmp.eq.f32.partialorder %v1325_v46, 8.507059e+37  ;;  %v1722_v21 = vmul.f32 -1.442695, %v2630_v37  ;;  %v1876_v23 = vpop.eup %1875  ;;  %v1396_v57 = vmul.f32 %v1209_v20, %v2467_v58  ;;  %v1328_v25 = vor.u32 1.1754944e-38, %v1327_v28 }
 0x111   : > { %1883 = vpow2.f32 %v1714_v13  ;;  %v639_v26 = vadd.f32 %v569_v0, %v367_v14  ;;  %v1878_v2 = vpop.eup %1877  ;;  %v1324_v31 = vsel %vm1323_vm14, %v1874_v43, %v1320_v10  ;;  %v2647_v19 = vadd.f32 1.0, %v1876_v23 }
 0x112   : > { %1885 = vpow2.f32 %v1722_v21  ;;  %v2650_v12 = vadd.f32 %v2554_v15, %v730_v48  ;;  %v1428_v17 = vpack.c.bf16 %v1396_v57, %v1396_v57  ;;  %v1329_v47 = vsel %vm1326_vm13, %v1328_v25, %v1324_v31 }
 0x113   : > { %v2652_v27 = vadd.f32 1.0, %v1878_v2  ;;  %v1730_v58 = vmul.f32 -1.442695, %v2636_v18  ;;  %672 = vst.msk [vmem:[#allocation2 + $0x38] sm:$0xff] %vm2825_vm3, %v639_v26  ;;  %v1404_v30 = vmul.f32 %v1329_v47, %v2476_v3  ;;  %1887 = vrcp.f32 %v2647_v19 }
 0x114   : > { %v1880_v11 = vpop.eup %1879  ;;  %1461 = vst.msk [vmem:[%s2202_s30 + $0x50] sm:$0xf] %vm1440_vm9, %v1428_v17  ;;  %v980_v33 = vand.u32 2147483647, %v2647_v19  ;;  %v1738_v40 = vmul.f32 -1.442695, %v2650_v12  ;;  %vm976_vm15 = vweird.f32 %v2647_v19 }
 0x115   : > { %v1882_v32 = vpop.eup %1881  ;;  %1889 = vrcp.f32 %v2652_v27  ;;  %v1436_v45 = vpack.c.bf16 %v1404_v30, %v1404_v30  ;;  %v2661_v46 = vadd.f32 1.0, %v1880_v11  ;;  %v982_v3 = vand.u32 2147483648, %v2647_v19 }
 0x116   : > { %v2664_v38 = vadd.f32 1.0, %v1882_v32  ;;  %1891 = vpow2.f32 %v1730_v58  ;;  %v1100_v42 = vand.u32 2147483647, %v2652_v27  ;;  %v1102_v60 = vand.u32 2147483648, %v2652_v27 }
 0x117   : > { %v1884_v22 = vpop.eup %1883  ;;  %1469 = vst.msk [vmem:[%s2202_s30 + $0x70] sm:$0xf] %vm1440_vm9, %v1436_v45  ;;  %1893 = vrcp.f32 %v2661_v46  ;;  %vm1096_vm0 = vweird.f32 %v2652_v27  ;;  %v1222_v43 = vand.u32 2147483648, %v2661_v46  ;;  %vm2682_vm1 = vcmp.eq.f32.partialorder %v980_v33, 8.507059e+37 }
 0x118   : > { %v1886_v28 = vpop.eup %1885  ;;  %1895 = vrcp.f32 %v2664_v38  ;;  %v2677_v44 = vadd.f32 1.0, %v1884_v22  ;;  %v1220_v52 = vand.u32 2147483647, %v2661_v46  ;;  %v1342_v54 = vand.u32 2147483648, %v2664_v38 }
 0x119   : > { %v1888_v5 = vpop.eup %1887  ;;  %v2679_v49 = vadd.f32 1.0, %v1886_v28  ;;  %1897 = vpow2.f32 %v1738_v40  ;;  %v983_v29 = vor.u32 1.1754944e-38, %v982_v3  ;;  %v1340_v34 = vand.u32 2147483647, %v2664_v38 }
 0x11a   : > { %v972_v51 = vmul.f32 %v1888_v5, %v2647_v19  ;;  %1899 = vrcp.f32 %v2677_v44  ;;  %vm2691_vm2 = vcmp.eq.f32.partialorder %v1100_v42, 8.507059e+37  ;;  %v1103_v39 = vor.u32 1.1754944e-38, %v1102_v60 }
 0x11b   : > { %v1890_v50 = vpop.eup %1889  ;;  %vm1216_vm4 = vweird.f32 %v2661_v46  ;;  %vm977_vm5 = vweird.f32 %v1888_v5  ;;  %v1223_v63 = vor.u32 1.1754944e-38, %v1222_v43  ;;  %vm1336_vm6 = vweird.f32 %v2664_v38 }
 0x11c   : > { %v1092_v55 = vmul.f32 %v1890_v50, %v2652_v27  ;;  %v1892_v59 = vpop.eup %1891  ;;  %v973_v61 = vsub.f32 1.0, %v972_v51  ;;  %1901 = vrcp.f32 %v2679_v49  ;;  %vm1097_vm7 = vweird.f32 %v1890_v50  ;;  %vm978_vm11 = vmor %vm976_vm15, %vm977_vm5 }
 0x11d   : > { %v1894_v6 = vpop.eup %1893  ;;  %vm2699_vm10 = vcmp.eq.f32.partialorder %v1220_v52, 8.507059e+37  ;;  %v1343_v14 = vor.u32 1.1754944e-38, %v1342_v54  ;;  %vm2704_vm12 = vcmp.eq.f32.partialorder %v1340_v34, 8.507059e+37  ;;  %v995_v48 = vand.u32 2147483647, %v2677_v44  ;;  %vm1098_vm8 = vmor %vm1096_vm0, %vm1097_vm7 }
 0x11e   : > { %v1093_v7 = vsub.f32 1.0, %v1092_v55  ;;  %v1896_v1 = vpop.eup %1895  ;;  %v974_v8 = vmul.f32 %v1888_v5, %v973_v61  ;;  %v1212_v35 = vmul.f32 %v1894_v6, %v2661_v46  ;;  %v997_v23 = vand.u32 2147483648, %v2677_v44 }
 0x11f   : > { %v1332_v62 = vmul.f32 %v1896_v1, %v2664_v38  ;;  %v1898_v20 = vpop.eup %1897  ;;  %v1115_v57 = vand.u32 2147483647, %v2679_v49  ;;  %vm1217_vm13 = vweird.f32 %v1894_v6  ;;  %vm1337_vm14 = vweird.f32 %v1896_v1 }
 0x120   : > { %v1094_v0 = vmul.f32 %v1890_v50, %v1093_v7  ;;  %v975_v10 = vadd.f32 %v1888_v5, %v974_v8  ;;  %v1213_v21 = vsub.f32 1.0, %v1212_v35  ;;  %v1900_v25 = vpop.eup %1899  ;;  %vm1111_vm3 = vweird.f32 %v2679_v49  ;;  %vm1218_vm15 = vmor %vm1216_vm4, %vm1217_vm13  ;;  %v375_v7 = vld [vmem:[#allocation2 + $0x78] sm:$0xff] }
 0x121   : > { %v1333_v2 = vsub.f32 1.0, %v1332_v62  ;;  %v987_v47 = vmul.f32 %v1900_v25, %v2677_v44  ;;  %v2720_v58 = vadd.f32 1.0, %v1892_v59  ;;  %v2724_v45 = vadd.f32 1.0, %v1898_v20  ;;  %v707_v59 = vld [vmem:[#allocation2 + $0x38] sm:$0xff] }
 0x122   : > { %v1095_v26 = vadd.f32 %v1890_v50, %v1094_v0  ;;  %v979_v31 = vsel %vm978_vm11, %v1888_v5, %v975_v10  ;;  %v1214_v17 = vmul.f32 %v1894_v6, %v1213_v21  ;;  %v1902_v11 = vpop.eup %1901  ;;  %vm992_vm0 = vweird.f32 %v1900_v25  ;;  %v629_v0 = vpop.f32.mrf.mxu3 }
 0x123   : > { %v984_v19 = vsel %vm2682_vm1, %v983_v29, %v979_v31  ;;  %v1334_v32 = vmul.f32 %v1896_v1, %v1333_v2  ;;  %v988_v40 = vsub.f32 1.0, %v987_v47  ;;  %v1107_v42 = vmul.f32 %v1902_v11, %v2679_v49  ;;  %vm1338_vm1 = vmor %vm1336_vm6, %vm1337_vm14 }
 0x124   : > { %v1099_v30 = vsel %vm1098_vm8, %v1890_v50, %v1095_v26  ;;  %v1381_v22 = vmul.f32 %v984_v19, %v2557_v16  ;;  %v1215_v27 = vadd.f32 %v1894_v6, %v1214_v17  ;;  %1903 = vrcp.f32 %v2720_v58 }
 0x125   : > { %v1104_v33 = vsel %vm2691_vm2, %v1103_v39, %v1099_v30  ;;  %v1335_v3 = vadd.f32 %v1896_v1, %v1334_v32  ;;  %v989_v16 = vmul.f32 %v1900_v25, %v988_v40  ;;  %v1108_v50 = vsub.f32 1.0, %v1107_v42 }
 0x126   : > { %v1389_v28 = vmul.f32 %v1104_v33, %v2566_v41  ;;  %v1413_v60 = vpack.c.bf16 %v1381_v22, %v1381_v22  ;;  %v1219_v5 = vsel %vm1218_vm15, %v1894_v6, %v1215_v27  ;;  %v1117_v38 = vand.u32 2147483648, %v2679_v49 }
 0x127   : > { %v1224_v41 = vsel %vm2699_vm10, %v1223_v63, %v1219_v5  ;;  %v1339_v46 = vsel %vm1338_vm1, %v1896_v1, %v1335_v3  ;;  %v990_v52 = vadd.f32 %v1900_v25, %v989_v16  ;;  %vm2874_vm2 = vweird.f32 %v2677_v44  ;;  %v589_v63 = vpop.f32.mrf.mxu1 }
 0x128   : > { %v1421_v43 = vpack.c.bf16 %v1389_v28, %v1389_v28  ;;  %1446 = vst.msk [vmem:[%s2202_s30 + $0x14] sm:$0xf] %vm1440_vm9, %v1413_v60  ;;  %v1397_v51 = vmul.f32 %v1224_v41, %v2574_v56  ;;  %v1344_v9 = vsel %vm2704_vm12, %v1343_v14, %v1339_v46  ;;  %vm993_vm4 = vmor %vm2874_vm2, %vm992_vm0  ;;  %v998_v29 = vor.u32 1.1754944e-38, %v997_v23  ;;  %v391_v14 = vld [vmem:[#allocation2 + $0xf8] sm:$0xff] }
 0x129   : > { %v1405_v54 = vmul.f32 %v1344_v9, %v2577_v24  ;;  %v1109_v55 = vmul.f32 %v1902_v11, %v1108_v50  ;;  %vm1112_vm5 = vweird.f32 %v1902_v11  ;;  %v994_v34 = vsel %vm993_vm4, %v1900_v25, %v990_v52 }
 0x12a   : > { %1454 = vst.msk [vmem:[%s2202_s30 + $0x34] sm:$0xf] %vm1440_vm9, %v1421_v43  ;;  %v1429_v56 = vpack.c.bf16 %v1397_v51, %v1397_v51  ;;  %vm996_vm6 = vcmp.eq.f32.partialorder %v995_v48, 8.507059e+37  ;;  %1905 = vrcp.f32 %v2724_v45  ;;  %v1904_v6 = vpop.eup %1903  ;;  %vm1113_vm7 = vmor %vm1111_vm3, %vm1112_vm5  ;;  %v1118_v44 = vor.u32 1.1754944e-38, %v1117_v38 }
 0x12b   : > { %v1437_v61 = vpack.c.bf16 %v1405_v54, %v1405_v54  ;;  %v999_v4 = vsel %vm996_vm6, %v998_v29, %v994_v34  ;;  %v1110_v39 = vadd.f32 %v1902_v11, %v1109_v55  ;;  %vm1116_vm10 = vcmp.eq.f32.partialorder %v1115_v57, 8.507059e+37 }
 0x12c   : > { %1462 = vst.msk [vmem:[%s2202_s30 + $0x54] sm:$0xf] %vm1440_vm9, %v1429_v56  ;;  %v1382_v24 = vmul.f32 %v999_v4, %v2624_v36  ;;  %v1227_v8 = vmul.f32 %v1904_v6, %v2720_v58  ;;  %v2764_v35 = vadd.f32 %v2554_v15, %v707_v59  ;;  %v609_v36 = vpop.f32.mrf.mxu2  ;;  %v647_v21 = vadd.f32 %v589_v63, %v375_v7 }
 0x12d   : > { %1470 = vst.msk [vmem:[%s2202_s30 + $0x74] sm:$0xf] %vm1440_vm9, %v1437_v61  ;;  %v1114_v1 = vsel %vm1113_vm7, %v1902_v11, %v1110_v39  ;;  %v1235_v23 = vand.u32 2147483647, %v2720_v58  ;;  %v1237_v57 = vand.u32 2147483648, %v2720_v58  ;;  %v655_v25 = vadd.f32 %v609_v36, %v383_v53 }
 0x12e   : > { %v1414_v62 = vpack.c.bf16 %v1382_v24, %v1382_v24  ;;  %v1119_v13 = vsel %vm1116_vm10, %v1118_v44, %v1114_v1  ;;  %v1228_v20 = vsub.f32 1.0, %v1227_v8  ;;  %v1715_v10 = vmul.f32 -1.442695, %v2764_v35 }
 0x12f   : > { %v1390_v48 = vmul.f32 %v1119_v13, %v2630_v37  ;;  %v663_v26 = vadd.f32 %v629_v0, %v391_v14  ;;  %vm1232_vm3 = vweird.f32 %v1904_v6  ;;  %vm2875_vm12 = vcmask 195584  }
 0x130   : > { %v1906_v49 = vpop.eup %1905  ;;  %1447 = vst.msk [vmem:[%s2202_s30 + $0x18] sm:$0xf] %vm1440_vm9, %v1414_v62  ;;  %v1229_v31 = vmul.f32 %v1904_v6, %v1228_v20  ;;  %1907 = vpow2.f32 %v1715_v10  ;;  %vm2876_vm8 = vmmov %vm2875_vm12  ;;  %vm1231_vm11 = vweird.f32 %v2720_v58  ;;  %v1238_v11 = vor.u32 1.1754944e-38, %v1237_v57 }
 0x131   : > { %v1422_v2 = vpack.c.bf16 %v1390_v48, %v1390_v48  ;;  %v1347_v17 = vmul.f32 %v1906_v49, %v2724_v45  ;;  %680 = vst.msk [vmem:[#allocation2 + $0x78] sm:$0xff] %vm2875_vm12, %v647_v21  ;;  %vm1233_vm13 = vmor %vm1231_vm11, %vm1232_vm3  ;;  %v1355_v19 = vand.u32 2147483647, %v2724_v45  ;;  %v1357_v30 = vand.u32 2147483648, %v2724_v45 }
 0x132   : > { %688 = vst.msk [vmem:[#allocation2 + $0xb8] sm:$0xff] %vm2876_vm8, %v655_v25  ;;  %v1230_v37 = vadd.f32 %v1904_v6, %v1229_v31  ;;  %vm2877_vm14 = vmmov %vm2876_vm8  ;;  %vm1236_vm15 = vcmp.eq.f32.partialorder %v1235_v23, 8.507059e+37  ;;  %vm1352_vm0 = vweird.f32 %v1906_v49  ;;  %vm1351_vm1 = vweird.f32 %v2724_v45 }
 0x133   : > { %1455 = vst.msk [vmem:[%s2202_s30 + $0x38] sm:$0xf] %vm1440_vm9, %v1422_v2  ;;  %v1348_v47 = vsub.f32 1.0, %v1347_v17  ;;  %vm1353_vm2 = vmor %vm1351_vm1, %vm1352_vm0  ;;  %vm1356_vm4 = vcmp.eq.f32.partialorder %v1355_v19, 8.507059e+37  ;;  %v1358_v28 = vor.u32 1.1754944e-38, %v1357_v30 }
 0x134   : > { %696 = vst.msk [vmem:[#allocation2 + $0xf8] sm:$0xff] %vm2877_vm14, %v663_v26  ;;  %v1234_v32 = vsel %vm1233_vm13, %v1904_v6, %v1230_v37 }
 0x135   : > { %v1349_v22 = vmul.f32 %v1906_v49, %v1348_v47  ;;  %v1239_v33 = vsel %vm1236_vm15, %v1238_v11, %v1234_v32 }
 0x136   : > { %v1398_v27 = vmul.f32 %v1239_v33, %v2636_v18  ;;  %v1908_v58 = vpop.eup %1907 }
 0x137   : > { %v1350_v40 = vadd.f32 %v1906_v49, %v1349_v22  ;;  %v871_v5 = vadd.f32 1.0, %v1908_v58 }
 0x138   : > { %v715_v3 = vld [vmem:[#allocation2 + $0x78] sm:$0xff]  ;;  %v1430_v42 = vpack.c.bf16 %v1398_v27, %v1398_v27 }
 0x139   : > { %v1354_v60 = vsel %vm1353_vm2, %v1906_v49, %v1350_v40  ;;  %v2784_v16 = vadd.f32 %v2554_v15, %v715_v3  ;;  %v723_v43 = vld [vmem:[#allocation2 + $0xb8] sm:$0xff]  ;;  %1909 = vrcp.f32 %v871_v5  ;;  %v1012_v34 = vand.u32 2147483648, %v871_v5 }
 0x13a   : > { %v1359_v41 = vsel %vm1356_vm4, %v1358_v28, %v1354_v60  ;;  %v2787_v46 = vadd.f32 %v2554_v15, %v723_v43  ;;  %1463 = vst.msk [vmem:[%s2202_s30 + $0x58] sm:$0xf] %vm1440_vm9, %v1430_v42  ;;  %vm1006_vm6 = vweird.f32 %v871_v5 }
 0x13b   : > { %v1406_v18 = vmul.f32 %v1359_v41, %v2650_v12  ;;  %v731_v45 = vld [vmem:[#allocation2 + $0xf8] sm:$0xff]  ;;  %v1723_v50 = vmul.f32 -1.442695, %v2784_v16  ;;  %v1013_v24 = vor.u32 1.1754944e-38, %v1012_v34 }
 0x13c   : > { %v1731_v51 = vmul.f32 -1.442695, %v2787_v46  ;;  %v2795_v9 = vadd.f32 %v2554_v15, %v731_v45  ;;  %v1010_v15 = vand.u32 2147483647, %v871_v5 }
 0x13d   : > { %v1438_v52 = vpack.c.bf16 %v1406_v18, %v1406_v18  ;;  %1911 = vpow2.f32 %v1723_v50 }
 0x13e   : > { %v1739_v38 = vmul.f32 -1.442695, %v2795_v9  ;;  %1913 = vpow2.f32 %v1731_v51  ;;  %vm1011_vm10 = vcmp.eq.f32.partialorder %v1010_v15, 8.507059e+37 }
 0x13f   : > { %1471 = vst.msk [vmem:[%s2202_s30 + $0x78] sm:$0xf] %vm1440_vm9, %v1438_v52  ;;  %v1910_v54 = vpop.eup %1909 }
 0x140   : > { %1915 = vpow2.f32 %v1739_v38  ;;  %v1002_v29 = vmul.f32 %v1910_v54, %v871_v5  ;;  %vm1007_vm5 = vweird.f32 %v1910_v54 }
 0x141   : > { %vm1008_vm7 = vmor %vm1006_vm6, %vm1007_vm5 }
 0x142   : > { %v1003_v55 = vsub.f32 1.0, %v1002_v29 }
 0x143   : > { %v1912_v12 = vpop.eup %1911 }
 0x144   : > { %v1914_v56 = vpop.eup %1913  ;;  %v879_v59 = vadd.f32 1.0, %v1912_v12  ;;  %v1004_v4 = vmul.f32 %v1910_v54, %v1003_v55 }
 0x145   : > { %v887_v39 = vadd.f32 1.0, %v1914_v56 }
 0x146   : > { %v1916_v61 = vpop.eup %1915  ;;  %1917 = vrcp.f32 %v879_v59  ;;  %v1005_v6 = vadd.f32 %v1910_v54, %v1004_v4  ;;  %v1130_v13 = vand.u32 2147483647, %v879_v59  ;;  %v1132_v20 = vand.u32 2147483648, %v879_v59 }
 0x147   : > { %1919 = vrcp.f32 %v887_v39  ;;  %v895_v44 = vadd.f32 1.0, %v1916_v61  ;;  %v1252_v21 = vand.u32 2147483648, %v887_v39  ;;  %vm1126_vm12 = vweird.f32 %v879_v59 }
 0x148   : > { %v1009_v7 = vsel %vm1008_vm7, %v1910_v54, %v1005_v6  ;;  %vm1131_vm11 = vcmp.eq.f32.partialorder %v1130_v13, 8.507059e+37  ;;  %vm1246_vm13 = vweird.f32 %v887_v39  ;;  %v1133_v2 = vor.u32 1.1754944e-38, %v1132_v20 }
 0x149   : > { %v1014_v63 = vsel %vm1011_vm10, %v1013_v24, %v1009_v7  ;;  %1921 = vrcp.f32 %v895_v44  ;;  %v1253_v17 = vor.u32 1.1754944e-38, %v1252_v21  ;;  %v1372_v37 = vand.u32 2147483648, %v895_v44 }
 0x14a   : > { %v1383_v1 = vmul.f32 %v1014_v63, %v2764_v35  ;;  %v1250_v35 = vand.u32 2147483647, %v887_v39  ;;  %v1370_v19 = vand.u32 2147483647, %v895_v44  ;;  %vm1366_vm2 = vweird.f32 %v895_v44 }
 0x14b   : > { %v1373_v58 = vor.u32 1.1754944e-38, %v1372_v37 }
 0x14c   : > { %v1918_v8 = vpop.eup %1917  ;;  %v1415_v36 = vpack.c.bf16 %v1383_v1, %v1383_v1  ;;  %vm1251_vm1 = vcmp.eq.f32.partialorder %v1250_v35, 8.507059e+37  ;;  %vm1371_vm5 = vcmp.eq.f32.partialorder %v1370_v19, 8.507059e+37 }
 0x14d   : > { %v1920_v53 = vpop.eup %1919  ;;  %v1122_v14 = vmul.f32 %v1918_v8, %v879_v59  ;;  %vm1127_vm3 = vweird.f32 %v1918_v8 }
 0x14e   : > { %v1242_v0 = vmul.f32 %v1920_v53, %v887_v39  ;;  %1448 = vst.msk [vmem:[%s2202_s30 + $0x1c] sm:$0xf] %vm1440_vm9, %v1415_v36  ;;  %vm1247_vm8 = vweird.f32 %v1920_v53  ;;  %vm1128_vm14 = vmor %vm1126_vm12, %vm1127_vm3 }
 0x14f   : > { %v1123_v62 = vsub.f32 1.0, %v1122_v14  ;;  %v1922_v48 = vpop.eup %1921  ;;  %vm1248_vm15 = vmor %vm1246_vm13, %vm1247_vm8 }
 0x150   : > { %v1243_v10 = vsub.f32 1.0, %v1242_v0  ;;  %v1362_v23 = vmul.f32 %v1922_v48, %v895_v44  ;;  %vm1367_vm0 = vweird.f32 %v1922_v48 }
 0x151   : > { %v1124_v49 = vmul.f32 %v1918_v8, %v1123_v62  ;;  %vm1368_vm4 = vmor %vm1366_vm2, %vm1367_vm0 }
 0x152   : > { %v1244_v57 = vmul.f32 %v1920_v53, %v1243_v10  ;;  %v1363_v26 = vsub.f32 1.0, %v1362_v23 }
 0x153   : > { %v1125_v25 = vadd.f32 %v1918_v8, %v1124_v49 }
 0x154   : > { %v1245_v31 = vadd.f32 %v1920_v53, %v1244_v57  ;;  %v1364_v11 = vmul.f32 %v1922_v48, %v1363_v26 }
 0x155   : > { %v1129_v47 = vsel %vm1128_vm14, %v1918_v8, %v1125_v25 }
 0x156   : > { %v1134_v30 = vsel %vm1131_vm11, %v1133_v2, %v1129_v47  ;;  %v1249_v32 = vsel %vm1248_vm15, %v1920_v53, %v1245_v31  ;;  %v1365_v27 = vadd.f32 %v1922_v48, %v1364_v11 }
 0x157   : > { %v1391_v22 = vmul.f32 %v1134_v30, %v2784_v16  ;;  %v1254_v33 = vsel %vm1251_vm1, %v1253_v17, %v1249_v32 }
 0x158   : > { %v1399_v40 = vmul.f32 %v1254_v33, %v2787_v46  ;;  %v1369_v3 = vsel %vm1368_vm4, %v1922_v48, %v1365_v27 }
 0x159   : > { %v1423_v28 = vpack.c.bf16 %v1391_v22, %v1391_v22  ;;  %v1374_v60 = vsel %vm1371_vm5, %v1373_v58, %v1369_v3 }
 0x15a   : > { %v1431_v42 = vpack.c.bf16 %v1399_v40, %v1399_v40  ;;  %v1407_v5 = vmul.f32 %v1374_v60, %v2795_v9 }
 0x15b   : > { %1456 = vst.msk [vmem:[%s2202_s30 + $0x3c] sm:$0xf] %vm1440_vm9, %v1423_v28 }
 0x15c   : > { %1464 = vst.msk [vmem:[%s2202_s30 + $0x5c] sm:$0xf] %vm1440_vm9, %v1431_v42  ;;  %v1439_v16 = vpack.c.bf16 %v1407_v5, %v1407_v5 }
 0x15e   : > { %1472 = vst.msk [vmem:[%s2202_s30 + $0x7c] sm:$0xf] %vm1440_vm9, %v1439_v16 }
 0x15f PF: > { %s13_s14 = sadd.s32 1, %s1946_s14   ;;  %s2878_s12 = smov %s1942_s13 }
 0x160   : > { %p10_p5 = scmp.ge.s32.totalorder %s13_s14, 4   ;;  %s2879_s13 = smov %s2881_s15 }
 0x162   :  { %12 = sbr.rel (!%p10_p5) target bundleno = 2 (0x2), region = 76 }

</bundles_post_ra>
